<compile_context>
chip_gen: v6e
topology: v6e:2x2x1
jax: 0.10.0
libtpu: 0.0.40
codegen_flags: <defaults>
</compile_context>

<pallas_src>
import jax
import jax.numpy as jnp
from jax import lax
from jax.experimental import pallas as pl
from jax.experimental.pallas import tpu as pltpu

# ----------------------------- config ---------------------------------------
B = 2            # batch
S = 8            # sequence length
H = 64           # hidden size ("768" in real DistilBERT)
NUM_HEADS = 2
DH = H // NUM_HEADS
FFN = 128
LAYERS = 2       # ("6" in real DistilBERT)
HL = 32          # lstm_hidden_size ("256" in the module)
NUM_LABELS = 3
NUM_LABELS_PAD = 128     # lane-friendly padded classifier width (sliced in wrapper)
VOCAB = 50
MAX_POS = 32
LN_EPS = 1e-12
ATTN_SCALE = 1.0 / (DH ** 0.5)


# ----------------------------- in-kernel helpers -----------------------------
def _layer_norm(x, g, b, eps=LN_EPS):
    mu = jnp.mean(x, axis=-1, keepdims=True)
    d = x - mu
    var = jnp.mean(d * d, axis=-1, keepdims=True)
    return d * lax.rsqrt(var + eps) * g + b


def _gelu(x):
    # tanh-approximate GELU (HF DistilBERT uses erf GELU; deviation is negligible here)
    return 0.5 * x * (1.0 + jnp.tanh(0.7978845608028654 * (x + 0.044715 * x * x * x)))


# ----------------------------- fused kernel ----------------------------------
def _fused_forward_kernel(
    onehot_ref, pos_ref, bias_ref, emb_g_ref, emb_b_ref, word_emb_ref,
    qkv_w_ref, qkv_b_ref, o_w_ref, o_b_ref,
    ln1_g_ref, ln1_b_ref,
    ff1_w_ref, ff1_b_ref, ff2_w_ref, ff2_b_ref,
    ln2_g_ref, ln2_b_ref,
    lstm_wih_ref, lstm_b_ref, cls_w_ref, cls_b_ref,
    out_ref,
):
    """Entire DistilBertLSTMClassifier forward for one batch element (grid axis 0)."""
    f32 = jnp.float32

    # ---- DistilBERT embeddings: one_hot(ids) @ word_emb + pos, then LayerNorm ----
    word = jnp.dot(onehot_ref[0], word_emb_ref[...], preferred_element_type=f32)  # (S, H)
    pos = pos_ref[0:S, :]                                                          # (S, H)
    x = _layer_norm(word + pos, emb_g_ref[...], emb_b_ref[...])                    # (S, H)

    bias = bias_ref[0]          # (1, S) additive key-mask bias, broadcast over queries

    # ---- transformer layers (statically unrolled; all weights VMEM-resident) ----
    for l in range(LAYERS):
        # merged QKV projection: (S,H) x (H,3H) -> lane-dense (S, 3H)
        qkv = jnp.dot(x, qkv_w_ref[l], preferred_element_type=f32) + qkv_b_ref[l]
        q = qkv[:, 0 * H:1 * H]
        k = qkv[:, 1 * H:2 * H]
        v = qkv[:, 2 * H:3 * H]

        # attention: short unrolled head loop, everything stays in registers/VMEM
        ctx_heads = []
        for hh in range(NUM_HEADS):
            qh = q[:, hh * DH:(hh + 1) * DH]
            kh = k[:, hh * DH:(hh + 1) * DH]
            vh = v[:, hh * DH:(hh + 1) * DH]
            s = jnp.dot(qh, kh.T, preferred_element_type=f32) * ATTN_SCALE + bias  # (S, S)
            s = s - jnp.max(s, axis=-1, keepdims=True)
            p = jnp.exp(s)
            # EUP approx reciprocal instead of a VALU divide
            p = p * pl.reciprocal(jnp.sum(p, axis=-1, keepdims=True), approx=True)
            ctx_heads.append(jnp.dot(p, vh, preferred_element_type=f32))           # (S, DH)
        ctx = jnp.concatenate(ctx_heads, axis=-1)                                  # (S, H)

        attn_out = jnp.dot(ctx, o_w_ref[l], preferred_element_type=f32) + o_b_ref[l]
        x = _layer_norm(attn_out + x, ln1_g_ref[l], ln1_b_ref[l])                  # sa_layer_norm

        ff = _gelu(jnp.dot(x, ff1_w_ref[l], preferred_element_type=f32) + ff1_b_ref[l])
        ff = jnp.dot(ff, ff2_w_ref[l], preferred_element_type=f32) + ff2_b_ref[l]
        x = _layer_norm(ff + x, ln2_g_ref[l], ln2_b_ref[l])                        # output_layer_norm

    # ---- LSTM (PyTorch gate order i,f,g,o) ----
    # Only lstm_output[:, 0, :] reaches the classifier.  With zero initial state the
    # t=0 hidden state depends only on token 0 and h0 @ W_hh == 0, so a single cell
    # step is exactly equivalent to the full recurrence followed by slicing t=0.
    zx = jnp.dot(x, lstm_wih_ref[...], preferred_element_type=f32) + lstm_b_ref[...]  # (S, 4*HL)
    z0 = zx[0:1, :]                                                                    # (1, 4*HL)
    i_g = jax.nn.sigmoid(z0[:, 0 * HL:1 * HL])
    g_g = jnp.tanh(z0[:, 2 * HL:3 * HL])
    o_g = jax.nn.sigmoid(z0[:, 3 * HL:4 * HL])
    c1 = i_g * g_g                        # f-gate * c0 vanishes (c0 == 0)
    h1 = o_g * jnp.tanh(c1)               # (1, HL)  == lstm_output[b, 0, :]

    # ---- classifier (dropout is identity at inference; output padded to 128 lanes) ----
    logits = jnp.dot(h1, cls_w_ref[...], preferred_element_type=f32) + cls_b_ref[...]  # (1, 128)
    out_ref[0] = logits


# ----------------------------- wrapper ----------------------------------------
def model_forward(params, input_ids, attention_mask):
    # tiny wrapper-side prep (one-hot avoids in-kernel gather; mask -> additive bias)
    onehot = jax.nn.one_hot(input_ids, VOCAB, dtype=jnp.float32)                    # (B, S, VOCAB)
    mask_bias = ((1.0 - attention_mask.astype(jnp.float32)) * -1e9)[:, None, :]     # (B, 1, S)

    def _full(shape):
        if len(shape) == 2:
            return pl.BlockSpec(shape, lambda b: (0, 0))
        return pl.BlockSpec(shape, lambda b: (0, 0, 0))

    in_specs = [
        pl.BlockSpec((1, S, VOCAB), lambda b: (b, 0, 0)),    # onehot (per batch element)
        _full((MAX_POS, H)),                                 # pos_emb
        pl.BlockSpec((1, 1, S), lambda b: (b, 0, 0)),        # mask bias (per batch element)
        _full((1, H)), _full((1, H)),                        # embedding LayerNorm g, b
        _full((VOCAB, H)),                                   # word embedding table
        _full((LAYERS, H, 3 * H)), _full((LAYERS, 1, 3 * H)),   # merged QKV w, b
        _full((LAYERS, H, H)), _full((LAYERS, 1, H)),           # attn out proj w, b
        _full((LAYERS, 1, H)), _full((LAYERS, 1, H)),           # sa_layer_norm g, b
        _full((LAYERS, H, FFN)), _full((LAYERS, 1, FFN)),       # ffn lin1 w, b
        _full((LAYERS, FFN, H)), _full((LAYERS, 1, H)),         # ffn lin2 w, b
        _full((LAYERS, 1, H)), _full((LAYERS, 1, H)),           # output_layer_norm g, b
        _full((H, 4 * HL)), _full((1, 4 * HL)),                 # LSTM W_ih (pre-T), bias
        _full((HL, NUM_LABELS_PAD)), _full((1, NUM_LABELS_PAD)),  # classifier (padded)
    ]

    logits_pad = pl.pallas_call(
        _fused_forward_kernel,
        out_shape=jax.ShapeDtypeStruct((B, 1, NUM_LABELS_PAD), jnp.float32),
        grid=(B,),
        in_specs=in_specs,
        out_specs=pl.BlockSpec((1, 1, NUM_LABELS_PAD), lambda b: (b, 0, 0)),
        compiler_params=pltpu.CompilerParams(dimension_semantics=("parallel",)),
    )(
        onehot, params["pos_emb"], mask_bias,
        params["emb_ln_g"], params["emb_ln_b"], params["word_emb"],
        params["qkv_w"], params["qkv_b"], params["o_w"], params["o_b"],
        params["ln1_g"], params["ln1_b"],
        params["ff1_w"], params["ff1_b"], params["ff2_w"], params["ff2_b"],
        params["ln2_g"], params["ln2_b"],
        params["lstm_wih"], params["lstm_b"],
        params["cls_w_pad"], params["cls_b_pad"],
    )
    return logits_pad[:, 0, :NUM_LABELS]


# ----------------------------- params -----------------------------------------
def init_params(key):
    keys = iter(jax.random.split(key, 64))
    nxt = lambda: next(keys)
    w = lambda shape, scale=0.02: (scale * jax.random.normal(nxt(), shape)).astype(jnp.float32)

    def stack(make):
        return jnp.stack([make() for _ in range(LAYERS)], axis=0)

    params = {
        "word_emb": w((VOCAB, H)),
        "pos_emb": w((MAX_POS, H)),
        "emb_ln_g": jnp.ones((1, H), jnp.float32),
        "emb_ln_b": jnp.zeros((1, H), jnp.float32),
        # per-layer weights stacked along a leading LAYERS axis so the whole encoder is
        # passed to the single fused kernel as a handful of VMEM-resident arrays
        "qkv_w": stack(lambda: w((H, 3 * H))),
        "qkv_b": jnp.zeros((LAYERS, 1, 3 * H), jnp.float32),
        "o_w": stack(lambda: w((H, H))),
        "o_b": jnp.zeros((LAYERS, 1, H), jnp.float32),
        "ln1_g": jnp.ones((LAYERS, 1, H), jnp.float32),
        "ln1_b": jnp.zeros((LAYERS, 1, H), jnp.float32),
        "ff1_w": stack(lambda: w((H, FFN))),
        "ff1_b": jnp.zeros((LAYERS, 1, FFN), jnp.float32),
        "ff2_w": stack(lambda: w((FFN, H))),
        "ff2_b": jnp.zeros((LAYERS, 1, H), jnp.float32),
        "ln2_g": jnp.ones((LAYERS, 1, H), jnp.float32),
        "ln2_b": jnp.zeros((LAYERS, 1, H), jnp.float32),
        # LSTM weights stored pre-transposed as (in, 4*HL), PyTorch gate order (i,f,g,o);
        # bias = b_ih + b_hh combined.
        "lstm_wih": w((H, 4 * HL), 0.1),
        "lstm_whh": w((HL, 4 * HL), 0.1),   # part of the module's parameters, but unused by
                                            # the kernel: only lstm_output[:, 0, :] is consumed
                                            # and h0 == 0, so h0 @ W_hh contributes nothing.
        "lstm_b": jnp.zeros((1, 4 * HL), jnp.float32),
    }
    # classifier zero-padded to 128 output lanes (lane-dense store); wrapper slices back
    cls_w = w((HL, NUM_LABELS))
    params["cls_w_pad"] = jnp.zeros((HL, NUM_LABELS_PAD), jnp.float32).at[:, :NUM_LABELS].set(cls_w)
    params["cls_b_pad"] = jnp.zeros((1, NUM_LABELS_PAD), jnp.float32)
    return params


# ----------------------------- main --------------------------------------------
if __name__ == "__main__":
    root = jax.random.PRNGKey(0)
    kp, ki = jax.random.split(root)

    params = init_params(kp)
    input_ids = jax.random.randint(ki, (B, S), 0, VOCAB, dtype=jnp.int32)
    attention_mask = jnp.array([[1] * S,
                                [1] * 5 + [0] * (S - 5)], dtype=jnp.int32)

    logits = jax.jit(model_forward)(params, input_ids, attention_mask)
    logits = jax.block_until_ready(logits)

    assert logits.shape == (B, NUM_LABELS), logits.shape
    assert bool(jnp.all(jnp.isfinite(logits)))
    print("KERNEL_OK")
</pallas_src>

<mosaic_0001>
module attributes {stable_mosaic.version = 11 : i64} {
  func.func @_fused_forward_kernel(%arg0: i32, %arg1: memref<1x8x50xf32, #tpu.memory_space<vmem>>, %arg2: memref<32x64xf32, #tpu.memory_space<vmem>>, %arg3: memref<1x1x8xf32, #tpu.memory_space<vmem>>, %arg4: memref<1x64xf32, #tpu.memory_space<vmem>>, %arg5: memref<1x64xf32, #tpu.memory_space<vmem>>, %arg6: memref<50x64xf32, #tpu.memory_space<vmem>>, %arg7: memref<2x64x192xf32, #tpu.memory_space<vmem>>, %arg8: memref<2x1x192xf32, #tpu.memory_space<vmem>>, %arg9: memref<2x64x64xf32, #tpu.memory_space<vmem>>, %arg10: memref<2x1x64xf32, #tpu.memory_space<vmem>>, %arg11: memref<2x1x64xf32, #tpu.memory_space<vmem>>, %arg12: memref<2x1x64xf32, #tpu.memory_space<vmem>>, %arg13: memref<2x64x128xf32, #tpu.memory_space<vmem>>, %arg14: memref<2x1x128xf32, #tpu.memory_space<vmem>>, %arg15: memref<2x128x64xf32, #tpu.memory_space<vmem>>, %arg16: memref<2x1x64xf32, #tpu.memory_space<vmem>>, %arg17: memref<2x1x64xf32, #tpu.memory_space<vmem>>, %arg18: memref<2x1x64xf32, #tpu.memory_space<vmem>>, %arg19: memref<64x128xf32, #tpu.memory_space<vmem>>, %arg20: memref<1x128xf32, #tpu.memory_space<vmem>>, %arg21: memref<32x128xf32, #tpu.memory_space<vmem>>, %arg22: memref<1x128xf32, #tpu.memory_space<vmem>>, %arg23: memref<1x1x128xf32, #tpu.memory_space<vmem>>) attributes {dimension_semantics = [#tpu.dimension_semantics<parallel>], iteration_bounds = array<i64: 2>, scalar_prefetch = 0 : i64, scratch_operands = 0 : i64, tpu.core_type = #tpu.core_type<tc>, window_params = [{transform_indices = @transform_0, window_bounds = array<i64: 1, 8, 50>}, {pipeline_mode = #tpu.pipeline_mode<synchronous>, transform_indices = @transform_1, window_bounds = array<i64: 32, 64>}, {transform_indices = @transform_2, window_bounds = array<i64: 1, 1, 8>}, {pipeline_mode = #tpu.pipeline_mode<synchronous>, transform_indices = @transform_3, window_bounds = array<i64: 1, 64>}, {pipeline_mode = #tpu.pipeline_mode<synchronous>, transform_indices = @transform_4, window_bounds = array<i64: 1, 64>}, {pipeline_mode = #tpu.pipeline_mode<synchronous>, transform_indices = @transform_5, window_bounds = array<i64: 50, 64>}, {pipeline_mode = #tpu.pipeline_mode<synchronous>, transform_indices = @transform_6, window_bounds = array<i64: 2, 64, 192>}, {pipeline_mode = #tpu.pipeline_mode<synchronous>, transform_indices = @transform_7, window_bounds = array<i64: 2, 1, 192>}, {pipeline_mode = #tpu.pipeline_mode<synchronous>, transform_indices = @transform_8, window_bounds = array<i64: 2, 64, 64>}, {pipeline_mode = #tpu.pipeline_mode<synchronous>, transform_indices = @transform_9, window_bounds = array<i64: 2, 1, 64>}, {pipeline_mode = #tpu.pipeline_mode<synchronous>, transform_indices = @transform_10, window_bounds = array<i64: 2, 1, 64>}, {pipeline_mode = #tpu.pipeline_mode<synchronous>, transform_indices = @transform_11, window_bounds = array<i64: 2, 1, 64>}, {pipeline_mode = #tpu.pipeline_mode<synchronous>, transform_indices = @transform_12, window_bounds = array<i64: 2, 64, 128>}, {pipeline_mode = #tpu.pipeline_mode<synchronous>, transform_indices = @transform_13, window_bounds = array<i64: 2, 1, 128>}, {pipeline_mode = #tpu.pipeline_mode<synchronous>, transform_indices = @transform_14, window_bounds = array<i64: 2, 128, 64>}, {pipeline_mode = #tpu.pipeline_mode<synchronous>, transform_indices = @transform_15, window_bounds = array<i64: 2, 1, 64>}, {pipeline_mode = #tpu.pipeline_mode<synchronous>, transform_indices = @transform_16, window_bounds = array<i64: 2, 1, 64>}, {pipeline_mode = #tpu.pipeline_mode<synchronous>, transform_indices = @transform_17, window_bounds = array<i64: 2, 1, 64>}, {pipeline_mode = #tpu.pipeline_mode<synchronous>, transform_indices = @transform_18, window_bounds = array<i64: 64, 128>}, {pipeline_mode = #tpu.pipeline_mode<synchronous>, transform_indices = @transform_19, window_bounds = array<i64: 1, 128>}, {pipeline_mode = #tpu.pipeline_mode<synchronous>, transform_indices = @transform_20, window_bounds = array<i64: 32, 128>}, {pipeline_mode = #tpu.pipeline_mode<synchronous>, transform_indices = @transform_21, window_bounds = array<i64: 1, 128>}, {transform_indices = @transform_22, window_bounds = array<i64: 1, 1, 128>}]} {
    %c0 = arith.constant 0 : index
    %c0_0 = arith.constant 0 : index
    %c0_1 = arith.constant 0 : index
    %0 = vector.load %arg1[%c0, %c0_0, %c0_1] : memref<1x8x50xf32, #tpu.memory_space<vmem>>, vector<1x8x50xf32>
    %1 = vector.shape_cast %0 : vector<1x8x50xf32> to vector<8x50xf32>
    %c0_2 = arith.constant 0 : index
    %c0_3 = arith.constant 0 : index
    %2 = vector.load %arg6[%c0_2, %c0_3] : memref<50x64xf32, #tpu.memory_space<vmem>>, vector<50x64xf32>
    %cst = arith.constant dense<0.000000e+00> : vector<8x64xf32>
    %3 = tpu.matmul %1, %2, %cst {dimension_numbers = #tpu.dot_dimension_numbers<[1], [0], [0], [1], [0, 0, 1, 1], [], []>} : vector<8x50xf32>, vector<50x64xf32>, vector<8x64xf32> -> vector<8x64xf32>
    %c0_4 = arith.constant 0 : index
    %c0_5 = arith.constant 0 : index
    %4 = vector.load %arg2[%c0_4, %c0_5] : memref<32x64xf32, #tpu.memory_space<vmem>>, vector<8x64xf32>
    %5 = arith.addf %3, %4 : vector<8x64xf32>
    %c0_6 = arith.constant 0 : index
    %c0_7 = arith.constant 0 : index
    %6 = vector.load %arg4[%c0_6, %c0_7] : memref<1x64xf32, #tpu.memory_space<vmem>>, vector<1x64xf32>
    %c0_8 = arith.constant 0 : index
    %c0_9 = arith.constant 0 : index
    %7 = vector.load %arg5[%c0_8, %c0_9] : memref<1x64xf32, #tpu.memory_space<vmem>>, vector<1x64xf32>
    %cst_10 = arith.constant dense<0.000000e+00> : vector<8xf32>
    %8 = vector.multi_reduction <add>, %5, %cst_10 [1] : vector<8x64xf32> to vector<8xf32>
    %9 = vector.shape_cast %8 : vector<8xf32> to vector<8x1xf32>
    %cst_11 = arith.constant 6.400000e+01 : f32
    %10 = vector.broadcast %cst_11 : f32 to vector<8x1xf32>
    %11 = arith.divf %9, %10 : vector<8x1xf32>
    %12 = vector.broadcast %11 : vector<8x1xf32> to vector<8x64xf32>
    %13 = arith.subf %5, %12 : vector<8x64xf32>
    %14 = arith.mulf %13, %13 : vector<8x64xf32>
    %cst_12 = arith.constant dense<0.000000e+00> : vector<8xf32>
    %15 = vector.multi_reduction <add>, %14, %cst_12 [1] : vector<8x64xf32> to vector<8xf32>
    %16 = vector.shape_cast %15 : vector<8xf32> to vector<8x1xf32>
    %cst_13 = arith.constant 6.400000e+01 : f32
    %17 = vector.broadcast %cst_13 : f32 to vector<8x1xf32>
    %18 = arith.divf %16, %17 : vector<8x1xf32>
    %cst_14 = arith.constant 9.99999996E-13 : f32
    %19 = vector.broadcast %cst_14 : f32 to vector<8x1xf32>
    %20 = arith.addf %18, %19 : vector<8x1xf32>
    %21 = math.rsqrt %20 : vector<8x1xf32>
    %22 = vector.broadcast %21 : vector<8x1xf32> to vector<8x64xf32>
    %23 = arith.mulf %13, %22 : vector<8x64xf32>
    %24 = vector.broadcast %6 : vector<1x64xf32> to vector<8x64xf32>
    %25 = arith.mulf %23, %24 : vector<8x64xf32>
    %26 = vector.broadcast %7 : vector<1x64xf32> to vector<8x64xf32>
    %27 = arith.addf %25, %26 : vector<8x64xf32>
    %c0_15 = arith.constant 0 : index
    %c0_16 = arith.constant 0 : index
    %c0_17 = arith.constant 0 : index
    %28 = vector.load %arg3[%c0_15, %c0_16, %c0_17] : memref<1x1x8xf32, #tpu.memory_space<vmem>>, vector<1x1x8xf32>
    %29 = vector.shape_cast %28 : vector<1x1x8xf32> to vector<1x8xf32>
    %c0_18 = arith.constant 0 : index
    %c0_19 = arith.constant 0 : index
    %c0_20 = arith.constant 0 : index
    %30 = vector.load %arg7[%c0_18, %c0_19, %c0_20] : memref<2x64x192xf32, #tpu.memory_space<vmem>>, vector<1x64x192xf32>
    %31 = vector.shape_cast %30 : vector<1x64x192xf32> to vector<64x192xf32>
    %cst_21 = arith.constant dense<0.000000e+00> : vector<8x192xf32>
    %32 = tpu.matmul %27, %31, %cst_21 {dimension_numbers = #tpu.dot_dimension_numbers<[1], [0], [0], [1], [0, 0, 1, 1], [], []>} : vector<8x64xf32>, vector<64x192xf32>, vector<8x192xf32> -> vector<8x192xf32>
    %c0_22 = arith.constant 0 : index
    %c0_23 = arith.constant 0 : index
    %c0_24 = arith.constant 0 : index
    %33 = vector.load %arg8[%c0_22, %c0_23, %c0_24] : memref<2x1x192xf32, #tpu.memory_space<vmem>>, vector<1x1x192xf32>
    %34 = vector.shape_cast %33 : vector<1x1x192xf32> to vector<1x192xf32>
    %35 = vector.broadcast %34 : vector<1x192xf32> to vector<8x192xf32>
    %36 = arith.addf %32, %35 : vector<8x192xf32>
    %37 = vector.extract_strided_slice %36 {offsets = [0, 0], sizes = [8, 64], strides = [1, 1]} : vector<8x192xf32> to vector<8x64xf32>
    %38 = vector.extract_strided_slice %36 {offsets = [0, 64], sizes = [8, 64], strides = [1, 1]} : vector<8x192xf32> to vector<8x64xf32>
    %39 = vector.extract_strided_slice %36 {offsets = [0, 128], sizes = [8, 64], strides = [1, 1]} : vector<8x192xf32> to vector<8x64xf32>
    %40 = vector.extract_strided_slice %37 {offsets = [0, 0], sizes = [8, 32], strides = [1, 1]} : vector<8x64xf32> to vector<8x32xf32>
    %41 = vector.extract_strided_slice %38 {offsets = [0, 0], sizes = [8, 32], strides = [1, 1]} : vector<8x64xf32> to vector<8x32xf32>
    %42 = vector.extract_strided_slice %39 {offsets = [0, 0], sizes = [8, 32], strides = [1, 1]} : vector<8x64xf32> to vector<8x32xf32>
    %43 = tpu.transpose %41, [1, 0] : vector<8x32xf32> -> vector<32x8xf32>
    %cst_25 = arith.constant dense<0.000000e+00> : vector<8x8xf32>
    %44 = tpu.matmul %40, %43, %cst_25 {dimension_numbers = #tpu.dot_dimension_numbers<[1], [0], [0], [1], [0, 0, 1, 1], [], []>} : vector<8x32xf32>, vector<32x8xf32>, vector<8x8xf32> -> vector<8x8xf32>
    %cst_26 = arith.constant 0.176776692 : f32
    %45 = vector.broadcast %cst_26 : f32 to vector<8x8xf32>
    %46 = arith.mulf %44, %45 : vector<8x8xf32>
    %47 = vector.broadcast %29 : vector<1x8xf32> to vector<8x8xf32>
    %48 = arith.addf %46, %47 : vector<8x8xf32>
    %cst_27 = arith.constant dense<0xFF800000> : vector<8xf32>
    %49 = vector.multi_reduction <maximumf>, %48, %cst_27 [1] : vector<8x8xf32> to vector<8xf32>
    %50 = vector.shape_cast %49 : vector<8xf32> to vector<8x1xf32>
    %51 = vector.broadcast %50 : vector<8x1xf32> to vector<8x8xf32>
    %52 = arith.subf %48, %51 : vector<8x8xf32>
    %53 = math.exp %52 : vector<8x8xf32>
    %cst_28 = arith.constant dense<0.000000e+00> : vector<8xf32>
    %54 = vector.multi_reduction <add>, %53, %cst_28 [1] : vector<8x8xf32> to vector<8xf32>
    %55 = vector.shape_cast %54 : vector<8xf32> to vector<8x1xf32>
    %56 = tpu.reciprocal %55 {approx = true} : vector<8x1xf32> -> vector<8x1xf32>
    %57 = vector.broadcast %56 : vector<8x1xf32> to vector<8x8xf32>
    %58 = arith.mulf %53, %57 : vector<8x8xf32>
    %cst_29 = arith.constant dense<0.000000e+00> : vector<8x32xf32>
    %59 = tpu.matmul %58, %42, %cst_29 {dimension_numbers = #tpu.dot_dimension_numbers<[1], [0], [0], [1], [0, 0, 1, 1], [], []>} : vector<8x8xf32>, vector<8x32xf32>, vector<8x32xf32> -> vector<8x32xf32>
    %60 = vector.extract_strided_slice %37 {offsets = [0, 32], sizes = [8, 32], strides = [1, 1]} : vector<8x64xf32> to vector<8x32xf32>
    %61 = vector.extract_strided_slice %38 {offsets = [0, 32], sizes = [8, 32], strides = [1, 1]} : vector<8x64xf32> to vector<8x32xf32>
    %62 = vector.extract_strided_slice %39 {offsets = [0, 32], sizes = [8, 32], strides = [1, 1]} : vector<8x64xf32> to vector<8x32xf32>
    %63 = tpu.transpose %61, [1, 0] : vector<8x32xf32> -> vector<32x8xf32>
    %cst_30 = arith.constant dense<0.000000e+00> : vector<8x8xf32>
    %64 = tpu.matmul %60, %63, %cst_30 {dimension_numbers = #tpu.dot_dimension_numbers<[1], [0], [0], [1], [0, 0, 1, 1], [], []>} : vector<8x32xf32>, vector<32x8xf32>, vector<8x8xf32> -> vector<8x8xf32>
    %cst_31 = arith.constant 0.176776692 : f32
    %65 = vector.broadcast %cst_31 : f32 to vector<8x8xf32>
    %66 = arith.mulf %64, %65 : vector<8x8xf32>
    %67 = vector.broadcast %29 : vector<1x8xf32> to vector<8x8xf32>
    %68 = arith.addf %66, %67 : vector<8x8xf32>
    %cst_32 = arith.constant dense<0xFF800000> : vector<8xf32>
    %69 = vector.multi_reduction <maximumf>, %68, %cst_32 [1] : vector<8x8xf32> to vector<8xf32>
    %70 = vector.shape_cast %69 : vector<8xf32> to vector<8x1xf32>
    %71 = vector.broadcast %70 : vector<8x1xf32> to vector<8x8xf32>
    %72 = arith.subf %68, %71 : vector<8x8xf32>
    %73 = math.exp %72 : vector<8x8xf32>
    %cst_33 = arith.constant dense<0.000000e+00> : vector<8xf32>
    %74 = vector.multi_reduction <add>, %73, %cst_33 [1] : vector<8x8xf32> to vector<8xf32>
    %75 = vector.shape_cast %74 : vector<8xf32> to vector<8x1xf32>
    %76 = tpu.reciprocal %75 {approx = true} : vector<8x1xf32> -> vector<8x1xf32>
    %77 = vector.broadcast %76 : vector<8x1xf32> to vector<8x8xf32>
    %78 = arith.mulf %73, %77 : vector<8x8xf32>
    %cst_34 = arith.constant dense<0.000000e+00> : vector<8x32xf32>
    %79 = tpu.matmul %78, %62, %cst_34 {dimension_numbers = #tpu.dot_dimension_numbers<[1], [0], [0], [1], [0, 0, 1, 1], [], []>} : vector<8x8xf32>, vector<8x32xf32>, vector<8x32xf32> -> vector<8x32xf32>
    %80 = tpu.concatenate %59, %79 in 1 : vector<8x32xf32>, vector<8x32xf32> -> vector<8x64xf32>
    %c0_35 = arith.constant 0 : index
    %c0_36 = arith.constant 0 : index
    %c0_37 = arith.constant 0 : index
    %81 = vector.load %arg9[%c0_35, %c0_36, %c0_37] : memref<2x64x64xf32, #tpu.memory_space<vmem>>, vector<1x64x64xf32>
    %82 = vector.shape_cast %81 : vector<1x64x64xf32> to vector<64x64xf32>
    %cst_38 = arith.constant dense<0.000000e+00> : vector<8x64xf32>
    %83 = tpu.matmul %80, %82, %cst_38 {dimension_numbers = #tpu.dot_dimension_numbers<[1], [0], [0], [1], [0, 0, 1, 1], [], []>} : vector<8x64xf32>, vector<64x64xf32>, vector<8x64xf32> -> vector<8x64xf32>
    %c0_39 = arith.constant 0 : index
    %c0_40 = arith.constant 0 : index
    %c0_41 = arith.constant 0 : index
    %84 = vector.load %arg10[%c0_39, %c0_40, %c0_41] : memref<2x1x64xf32, #tpu.memory_space<vmem>>, vector<1x1x64xf32>
    %85 = vector.shape_cast %84 : vector<1x1x64xf32> to vector<1x64xf32>
    %86 = vector.broadcast %85 : vector<1x64xf32> to vector<8x64xf32>
    %87 = arith.addf %83, %86 : vector<8x64xf32>
    %88 = arith.addf %87, %27 : vector<8x64xf32>
    %c0_42 = arith.constant 0 : index
    %c0_43 = arith.constant 0 : index
    %c0_44 = arith.constant 0 : index
    %89 = vector.load %arg11[%c0_42, %c0_43, %c0_44] : memref<2x1x64xf32, #tpu.memory_space<vmem>>, vector<1x1x64xf32>
    %90 = vector.shape_cast %89 : vector<1x1x64xf32> to vector<1x64xf32>
    %c0_45 = arith.constant 0 : index
    %c0_46 = arith.constant 0 : index
    %c0_47 = arith.constant 0 : index
    %91 = vector.load %arg12[%c0_45, %c0_46, %c0_47] : memref<2x1x64xf32, #tpu.memory_space<vmem>>, vector<1x1x64xf32>
    %92 = vector.shape_cast %91 : vector<1x1x64xf32> to vector<1x64xf32>
    %cst_48 = arith.constant dense<0.000000e+00> : vector<8xf32>
    %93 = vector.multi_reduction <add>, %88, %cst_48 [1] : vector<8x64xf32> to vector<8xf32>
    %94 = vector.shape_cast %93 : vector<8xf32> to vector<8x1xf32>
    %cst_49 = arith.constant 6.400000e+01 : f32
    %95 = vector.broadcast %cst_49 : f32 to vector<8x1xf32>
    %96 = arith.divf %94, %95 : vector<8x1xf32>
    %97 = vector.broadcast %96 : vector<8x1xf32> to vector<8x64xf32>
    %98 = arith.subf %88, %97 : vector<8x64xf32>
    %99 = arith.mulf %98, %98 : vector<8x64xf32>
    %cst_50 = arith.constant dense<0.000000e+00> : vector<8xf32>
    %100 = vector.multi_reduction <add>, %99, %cst_50 [1] : vector<8x64xf32> to vector<8xf32>
    %101 = vector.shape_cast %100 : vector<8xf32> to vector<8x1xf32>
    %cst_51 = arith.constant 6.400000e+01 : f32
    %102 = vector.broadcast %cst_51 : f32 to vector<8x1xf32>
    %103 = arith.divf %101, %102 : vector<8x1xf32>
    %cst_52 = arith.constant 9.99999996E-13 : f32
    %104 = vector.broadcast %cst_52 : f32 to vector<8x1xf32>
    %105 = arith.addf %103, %104 : vector<8x1xf32>
    %106 = math.rsqrt %105 : vector<8x1xf32>
    %107 = vector.broadcast %106 : vector<8x1xf32> to vector<8x64xf32>
    %108 = arith.mulf %98, %107 : vector<8x64xf32>
    %109 = vector.broadcast %90 : vector<1x64xf32> to vector<8x64xf32>
    %110 = arith.mulf %108, %109 : vector<8x64xf32>
    %111 = vector.broadcast %92 : vector<1x64xf32> to vector<8x64xf32>
    %112 = arith.addf %110, %111 : vector<8x64xf32>
    %c0_53 = arith.constant 0 : index
    %c0_54 = arith.constant 0 : index
    %c0_55 = arith.constant 0 : index
    %113 = vector.load %arg13[%c0_53, %c0_54, %c0_55] : memref<2x64x128xf32, #tpu.memory_space<vmem>>, vector<1x64x128xf32>
    %114 = vector.shape_cast %113 : vector<1x64x128xf32> to vector<64x128xf32>
    %cst_56 = arith.constant dense<0.000000e+00> : vector<8x128xf32>
    %115 = tpu.matmul %112, %114, %cst_56 {dimension_numbers = #tpu.dot_dimension_numbers<[1], [0], [0], [1], [0, 0, 1, 1], [], []>} : vector<8x64xf32>, vector<64x128xf32>, vector<8x128xf32> -> vector<8x128xf32>
    %c0_57 = arith.constant 0 : index
    %c0_58 = arith.constant 0 : index
    %c0_59 = arith.constant 0 : index
    %116 = vector.load %arg14[%c0_57, %c0_58, %c0_59] : memref<2x1x128xf32, #tpu.memory_space<vmem>>, vector<1x1x128xf32>
    %117 = vector.shape_cast %116 : vector<1x1x128xf32> to vector<1x128xf32>
    %118 = vector.broadcast %117 : vector<1x128xf32> to vector<8x128xf32>
    %119 = arith.addf %115, %118 : vector<8x128xf32>
    %cst_60 = arith.constant 5.000000e-01 : f32
    %120 = vector.broadcast %cst_60 : f32 to vector<8x128xf32>
    %121 = arith.mulf %120, %119 : vector<8x128xf32>
    %cst_61 = arith.constant 4.471500e-02 : f32
    %122 = vector.broadcast %cst_61 : f32 to vector<8x128xf32>
    %123 = arith.mulf %122, %119 : vector<8x128xf32>
    %124 = arith.mulf %123, %119 : vector<8x128xf32>
    %125 = arith.mulf %124, %119 : vector<8x128xf32>
    %126 = arith.addf %119, %125 : vector<8x128xf32>
    %cst_62 = arith.constant 0.797884583 : f32
    %127 = vector.broadcast %cst_62 : f32 to vector<8x128xf32>
    %128 = arith.mulf %127, %126 : vector<8x128xf32>
    %129 = math.tanh %128 : vector<8x128xf32>
    %cst_63 = arith.constant 1.000000e+00 : f32
    %130 = vector.broadcast %cst_63 : f32 to vector<8x128xf32>
    %131 = arith.addf %130, %129 : vector<8x128xf32>
    %132 = arith.mulf %121, %131 : vector<8x128xf32>
    %c0_64 = arith.constant 0 : index
    %c0_65 = arith.constant 0 : index
    %c0_66 = arith.constant 0 : index
    %133 = vector.load %arg15[%c0_64, %c0_65, %c0_66] : memref<2x128x64xf32, #tpu.memory_space<vmem>>, vector<1x128x64xf32>
    %134 = vector.shape_cast %133 : vector<1x128x64xf32> to vector<128x64xf32>
    %cst_67 = arith.constant dense<0.000000e+00> : vector<8x64xf32>
    %135 = tpu.matmul %132, %134, %cst_67 {dimension_numbers = #tpu.dot_dimension_numbers<[1], [0], [0], [1], [0, 0, 1, 1], [], []>} : vector<8x128xf32>, vector<128x64xf32>, vector<8x64xf32> -> vector<8x64xf32>
    %c0_68 = arith.constant 0 : index
    %c0_69 = arith.constant 0 : index
    %c0_70 = arith.constant 0 : index
    %136 = vector.load %arg16[%c0_68, %c0_69, %c0_70] : memref<2x1x64xf32, #tpu.memory_space<vmem>>, vector<1x1x64xf32>
    %137 = vector.shape_cast %136 : vector<1x1x64xf32> to vector<1x64xf32>
    %138 = vector.broadcast %137 : vector<1x64xf32> to vector<8x64xf32>
    %139 = arith.addf %135, %138 : vector<8x64xf32>
    %140 = arith.addf %139, %112 : vector<8x64xf32>
    %c0_71 = arith.constant 0 : index
    %c0_72 = arith.constant 0 : index
    %c0_73 = arith.constant 0 : index
    %141 = vector.load %arg17[%c0_71, %c0_72, %c0_73] : memref<2x1x64xf32, #tpu.memory_space<vmem>>, vector<1x1x64xf32>
    %142 = vector.shape_cast %141 : vector<1x1x64xf32> to vector<1x64xf32>
    %c0_74 = arith.constant 0 : index
    %c0_75 = arith.constant 0 : index
    %c0_76 = arith.constant 0 : index
    %143 = vector.load %arg18[%c0_74, %c0_75, %c0_76] : memref<2x1x64xf32, #tpu.memory_space<vmem>>, vector<1x1x64xf32>
    %144 = vector.shape_cast %143 : vector<1x1x64xf32> to vector<1x64xf32>
    %cst_77 = arith.constant dense<0.000000e+00> : vector<8xf32>
    %145 = vector.multi_reduction <add>, %140, %cst_77 [1] : vector<8x64xf32> to vector<8xf32>
    %146 = vector.shape_cast %145 : vector<8xf32> to vector<8x1xf32>
    %cst_78 = arith.constant 6.400000e+01 : f32
    %147 = vector.broadcast %cst_78 : f32 to vector<8x1xf32>
    %148 = arith.divf %146, %147 : vector<8x1xf32>
    %149 = vector.broadcast %148 : vector<8x1xf32> to vector<8x64xf32>
    %150 = arith.subf %140, %149 : vector<8x64xf32>
    %151 = arith.mulf %150, %150 : vector<8x64xf32>
    %cst_79 = arith.constant dense<0.000000e+00> : vector<8xf32>
    %152 = vector.multi_reduction <add>, %151, %cst_79 [1] : vector<8x64xf32> to vector<8xf32>
    %153 = vector.shape_cast %152 : vector<8xf32> to vector<8x1xf32>
    %cst_80 = arith.constant 6.400000e+01 : f32
    %154 = vector.broadcast %cst_80 : f32 to vector<8x1xf32>
    %155 = arith.divf %153, %154 : vector<8x1xf32>
    %cst_81 = arith.constant 9.99999996E-13 : f32
    %156 = vector.broadcast %cst_81 : f32 to vector<8x1xf32>
    %157 = arith.addf %155, %156 : vector<8x1xf32>
    %158 = math.rsqrt %157 : vector<8x1xf32>
    %159 = vector.broadcast %158 : vector<8x1xf32> to vector<8x64xf32>
    %160 = arith.mulf %150, %159 : vector<8x64xf32>
    %161 = vector.broadcast %142 : vector<1x64xf32> to vector<8x64xf32>
    %162 = arith.mulf %160, %161 : vector<8x64xf32>
    %163 = vector.broadcast %144 : vector<1x64xf32> to vector<8x64xf32>
    %164 = arith.addf %162, %163 : vector<8x64xf32>
    %c1 = arith.constant 1 : index
    %c0_82 = arith.constant 0 : index
    %c0_83 = arith.constant 0 : index
    %165 = vector.load %arg7[%c1, %c0_82, %c0_83] : memref<2x64x192xf32, #tpu.memory_space<vmem>>, vector<1x64x192xf32>
    %166 = vector.shape_cast %165 : vector<1x64x192xf32> to vector<64x192xf32>
    %cst_84 = arith.constant dense<0.000000e+00> : vector<8x192xf32>
    %167 = tpu.matmul %164, %166, %cst_84 {dimension_numbers = #tpu.dot_dimension_numbers<[1], [0], [0], [1], [0, 0, 1, 1], [], []>} : vector<8x64xf32>, vector<64x192xf32>, vector<8x192xf32> -> vector<8x192xf32>
    %c1_85 = arith.constant 1 : index
    %c0_86 = arith.constant 0 : index
    %c0_87 = arith.constant 0 : index
    %168 = vector.load %arg8[%c1_85, %c0_86, %c0_87] : memref<2x1x192xf32, #tpu.memory_space<vmem>>, vector<1x1x192xf32>
    %169 = vector.shape_cast %168 : vector<1x1x192xf32> to vector<1x192xf32>
    %170 = vector.broadcast %169 : vector<1x192xf32> to vector<8x192xf32>
    %171 = arith.addf %167, %170 : vector<8x192xf32>
    %172 = vector.extract_strided_slice %171 {offsets = [0, 0], sizes = [8, 64], strides = [1, 1]} : vector<8x192xf32> to vector<8x64xf32>
    %173 = vector.extract_strided_slice %171 {offsets = [0, 64], sizes = [8, 64], strides = [1, 1]} : vector<8x192xf32> to vector<8x64xf32>
    %174 = vector.extract_strided_slice %171 {offsets = [0, 128], sizes = [8, 64], strides = [1, 1]} : vector<8x192xf32> to vector<8x64xf32>
    %175 = vector.extract_strided_slice %172 {offsets = [0, 0], sizes = [8, 32], strides = [1, 1]} : vector<8x64xf32> to vector<8x32xf32>
    %176 = vector.extract_strided_slice %173 {offsets = [0, 0], sizes = [8, 32], strides = [1, 1]} : vector<8x64xf32> to vector<8x32xf32>
    %177 = vector.extract_strided_slice %174 {offsets = [0, 0], sizes = [8, 32], strides = [1, 1]} : vector<8x64xf32> to vector<8x32xf32>
    %178 = tpu.transpose %176, [1, 0] : vector<8x32xf32> -> vector<32x8xf32>
    %cst_88 = arith.constant dense<0.000000e+00> : vector<8x8xf32>
    %179 = tpu.matmul %175, %178, %cst_88 {dimension_numbers = #tpu.dot_dimension_numbers<[1], [0], [0], [1], [0, 0, 1, 1], [], []>} : vector<8x32xf32>, vector<32x8xf32>, vector<8x8xf32> -> vector<8x8xf32>
    %cst_89 = arith.constant 0.176776692 : f32
    %180 = vector.broadcast %cst_89 : f32 to vector<8x8xf32>
    %181 = arith.mulf %179, %180 : vector<8x8xf32>
    %182 = vector.broadcast %29 : vector<1x8xf32> to vector<8x8xf32>
    %183 = arith.addf %181, %182 : vector<8x8xf32>
    %cst_90 = arith.constant dense<0xFF800000> : vector<8xf32>
    %184 = vector.multi_reduction <maximumf>, %183, %cst_90 [1] : vector<8x8xf32> to vector<8xf32>
    %185 = vector.shape_cast %184 : vector<8xf32> to vector<8x1xf32>
    %186 = vector.broadcast %185 : vector<8x1xf32> to vector<8x8xf32>
    %187 = arith.subf %183, %186 : vector<8x8xf32>
    %188 = math.exp %187 : vector<8x8xf32>
    %cst_91 = arith.constant dense<0.000000e+00> : vector<8xf32>
    %189 = vector.multi_reduction <add>, %188, %cst_91 [1] : vector<8x8xf32> to vector<8xf32>
    %190 = vector.shape_cast %189 : vector<8xf32> to vector<8x1xf32>
    %191 = tpu.reciprocal %190 {approx = true} : vector<8x1xf32> -> vector<8x1xf32>
    %192 = vector.broadcast %191 : vector<8x1xf32> to vector<8x8xf32>
    %193 = arith.mulf %188, %192 : vector<8x8xf32>
    %cst_92 = arith.constant dense<0.000000e+00> : vector<8x32xf32>
    %194 = tpu.matmul %193, %177, %cst_92 {dimension_numbers = #tpu.dot_dimension_numbers<[1], [0], [0], [1], [0, 0, 1, 1], [], []>} : vector<8x8xf32>, vector<8x32xf32>, vector<8x32xf32> -> vector<8x32xf32>
    %195 = vector.extract_strided_slice %172 {offsets = [0, 32], sizes = [8, 32], strides = [1, 1]} : vector<8x64xf32> to vector<8x32xf32>
    %196 = vector.extract_strided_slice %173 {offsets = [0, 32], sizes = [8, 32], strides = [1, 1]} : vector<8x64xf32> to vector<8x32xf32>
    %197 = vector.extract_strided_slice %174 {offsets = [0, 32], sizes = [8, 32], strides = [1, 1]} : vector<8x64xf32> to vector<8x32xf32>
    %198 = tpu.transpose %196, [1, 0] : vector<8x32xf32> -> vector<32x8xf32>
    %cst_93 = arith.constant dense<0.000000e+00> : vector<8x8xf32>
    %199 = tpu.matmul %195, %198, %cst_93 {dimension_numbers = #tpu.dot_dimension_numbers<[1], [0], [0], [1], [0, 0, 1, 1], [], []>} : vector<8x32xf32>, vector<32x8xf32>, vector<8x8xf32> -> vector<8x8xf32>
    %cst_94 = arith.constant 0.176776692 : f32
    %200 = vector.broadcast %cst_94 : f32 to vector<8x8xf32>
    %201 = arith.mulf %199, %200 : vector<8x8xf32>
    %202 = vector.broadcast %29 : vector<1x8xf32> to vector<8x8xf32>
    %203 = arith.addf %201, %202 : vector<8x8xf32>
    %cst_95 = arith.constant dense<0xFF800000> : vector<8xf32>
    %204 = vector.multi_reduction <maximumf>, %203, %cst_95 [1] : vector<8x8xf32> to vector<8xf32>
    %205 = vector.shape_cast %204 : vector<8xf32> to vector<8x1xf32>
    %206 = vector.broadcast %205 : vector<8x1xf32> to vector<8x8xf32>
    %207 = arith.subf %203, %206 : vector<8x8xf32>
    %208 = math.exp %207 : vector<8x8xf32>
    %cst_96 = arith.constant dense<0.000000e+00> : vector<8xf32>
    %209 = vector.multi_reduction <add>, %208, %cst_96 [1] : vector<8x8xf32> to vector<8xf32>
    %210 = vector.shape_cast %209 : vector<8xf32> to vector<8x1xf32>
    %211 = tpu.reciprocal %210 {approx = true} : vector<8x1xf32> -> vector<8x1xf32>
    %212 = vector.broadcast %211 : vector<8x1xf32> to vector<8x8xf32>
    %213 = arith.mulf %208, %212 : vector<8x8xf32>
    %cst_97 = arith.constant dense<0.000000e+00> : vector<8x32xf32>
    %214 = tpu.matmul %213, %197, %cst_97 {dimension_numbers = #tpu.dot_dimension_numbers<[1], [0], [0], [1], [0, 0, 1, 1], [], []>} : vector<8x8xf32>, vector<8x32xf32>, vector<8x32xf32> -> vector<8x32xf32>
    %215 = tpu.concatenate %194, %214 in 1 : vector<8x32xf32>, vector<8x32xf32> -> vector<8x64xf32>
    %c1_98 = arith.constant 1 : index
    %c0_99 = arith.constant 0 : index
    %c0_100 = arith.constant 0 : index
    %216 = vector.load %arg9[%c1_98, %c0_99, %c0_100] : memref<2x64x64xf32, #tpu.memory_space<vmem>>, vector<1x64x64xf32>
    %217 = vector.shape_cast %216 : vector<1x64x64xf32> to vector<64x64xf32>
    %cst_101 = arith.constant dense<0.000000e+00> : vector<8x64xf32>
    %218 = tpu.matmul %215, %217, %cst_101 {dimension_numbers = #tpu.dot_dimension_numbers<[1], [0], [0], [1], [0, 0, 1, 1], [], []>} : vector<8x64xf32>, vector<64x64xf32>, vector<8x64xf32> -> vector<8x64xf32>
    %c1_102 = arith.constant 1 : index
    %c0_103 = arith.constant 0 : index
    %c0_104 = arith.constant 0 : index
    %219 = vector.load %arg10[%c1_102, %c0_103, %c0_104] : memref<2x1x64xf32, #tpu.memory_space<vmem>>, vector<1x1x64xf32>
    %220 = vector.shape_cast %219 : vector<1x1x64xf32> to vector<1x64xf32>
    %221 = vector.broadcast %220 : vector<1x64xf32> to vector<8x64xf32>
    %222 = arith.addf %218, %221 : vector<8x64xf32>
    %223 = arith.addf %222, %164 : vector<8x64xf32>
    %c1_105 = arith.constant 1 : index
    %c0_106 = arith.constant 0 : index
    %c0_107 = arith.constant 0 : index
    %224 = vector.load %arg11[%c1_105, %c0_106, %c0_107] : memref<2x1x64xf32, #tpu.memory_space<vmem>>, vector<1x1x64xf32>
    %225 = vector.shape_cast %224 : vector<1x1x64xf32> to vector<1x64xf32>
    %c1_108 = arith.constant 1 : index
    %c0_109 = arith.constant 0 : index
    %c0_110 = arith.constant 0 : index
    %226 = vector.load %arg12[%c1_108, %c0_109, %c0_110] : memref<2x1x64xf32, #tpu.memory_space<vmem>>, vector<1x1x64xf32>
    %227 = vector.shape_cast %226 : vector<1x1x64xf32> to vector<1x64xf32>
    %cst_111 = arith.constant dense<0.000000e+00> : vector<8xf32>
    %228 = vector.multi_reduction <add>, %223, %cst_111 [1] : vector<8x64xf32> to vector<8xf32>
    %229 = vector.shape_cast %228 : vector<8xf32> to vector<8x1xf32>
    %cst_112 = arith.constant 6.400000e+01 : f32
    %230 = vector.broadcast %cst_112 : f32 to vector<8x1xf32>
    %231 = arith.divf %229, %230 : vector<8x1xf32>
    %232 = vector.broadcast %231 : vector<8x1xf32> to vector<8x64xf32>
    %233 = arith.subf %223, %232 : vector<8x64xf32>
    %234 = arith.mulf %233, %233 : vector<8x64xf32>
    %cst_113 = arith.constant dense<0.000000e+00> : vector<8xf32>
    %235 = vector.multi_reduction <add>, %234, %cst_113 [1] : vector<8x64xf32> to vector<8xf32>
    %236 = vector.shape_cast %235 : vector<8xf32> to vector<8x1xf32>
    %cst_114 = arith.constant 6.400000e+01 : f32
    %237 = vector.broadcast %cst_114 : f32 to vector<8x1xf32>
    %238 = arith.divf %236, %237 : vector<8x1xf32>
    %cst_115 = arith.constant 9.99999996E-13 : f32
    %239 = vector.broadcast %cst_115 : f32 to vector<8x1xf32>
    %240 = arith.addf %238, %239 : vector<8x1xf32>
    %241 = math.rsqrt %240 : vector<8x1xf32>
    %242 = vector.broadcast %241 : vector<8x1xf32> to vector<8x64xf32>
    %243 = arith.mulf %233, %242 : vector<8x64xf32>
    %244 = vector.broadcast %225 : vector<1x64xf32> to vector<8x64xf32>
    %245 = arith.mulf %243, %244 : vector<8x64xf32>
    %246 = vector.broadcast %227 : vector<1x64xf32> to vector<8x64xf32>
    %247 = arith.addf %245, %246 : vector<8x64xf32>
    %c1_116 = arith.constant 1 : index
    %c0_117 = arith.constant 0 : index
    %c0_118 = arith.constant 0 : index
    %248 = vector.load %arg13[%c1_116, %c0_117, %c0_118] : memref<2x64x128xf32, #tpu.memory_space<vmem>>, vector<1x64x128xf32>
    %249 = vector.shape_cast %248 : vector<1x64x128xf32> to vector<64x128xf32>
    %cst_119 = arith.constant dense<0.000000e+00> : vector<8x128xf32>
    %250 = tpu.matmul %247, %249, %cst_119 {dimension_numbers = #tpu.dot_dimension_numbers<[1], [0], [0], [1], [0, 0, 1, 1], [], []>} : vector<8x64xf32>, vector<64x128xf32>, vector<8x128xf32> -> vector<8x128xf32>
    %c1_120 = arith.constant 1 : index
    %c0_121 = arith.constant 0 : index
    %c0_122 = arith.constant 0 : index
    %251 = vector.load %arg14[%c1_120, %c0_121, %c0_122] : memref<2x1x128xf32, #tpu.memory_space<vmem>>, vector<1x1x128xf32>
    %252 = vector.shape_cast %251 : vector<1x1x128xf32> to vector<1x128xf32>
    %253 = vector.broadcast %252 : vector<1x128xf32> to vector<8x128xf32>
    %254 = arith.addf %250, %253 : vector<8x128xf32>
    %cst_123 = arith.constant 5.000000e-01 : f32
    %255 = vector.broadcast %cst_123 : f32 to vector<8x128xf32>
    %256 = arith.mulf %255, %254 : vector<8x128xf32>
    %cst_124 = arith.constant 4.471500e-02 : f32
    %257 = vector.broadcast %cst_124 : f32 to vector<8x128xf32>
    %258 = arith.mulf %257, %254 : vector<8x128xf32>
    %259 = arith.mulf %258, %254 : vector<8x128xf32>
    %260 = arith.mulf %259, %254 : vector<8x128xf32>
    %261 = arith.addf %254, %260 : vector<8x128xf32>
    %cst_125 = arith.constant 0.797884583 : f32
    %262 = vector.broadcast %cst_125 : f32 to vector<8x128xf32>
    %263 = arith.mulf %262, %261 : vector<8x128xf32>
    %264 = math.tanh %263 : vector<8x128xf32>
    %cst_126 = arith.constant 1.000000e+00 : f32
    %265 = vector.broadcast %cst_126 : f32 to vector<8x128xf32>
    %266 = arith.addf %265, %264 : vector<8x128xf32>
    %267 = arith.mulf %256, %266 : vector<8x128xf32>
    %c1_127 = arith.constant 1 : index
    %c0_128 = arith.constant 0 : index
    %c0_129 = arith.constant 0 : index
    %268 = vector.load %arg15[%c1_127, %c0_128, %c0_129] : memref<2x128x64xf32, #tpu.memory_space<vmem>>, vector<1x128x64xf32>
    %269 = vector.shape_cast %268 : vector<1x128x64xf32> to vector<128x64xf32>
    %cst_130 = arith.constant dense<0.000000e+00> : vector<8x64xf32>
    %270 = tpu.matmul %267, %269, %cst_130 {dimension_numbers = #tpu.dot_dimension_numbers<[1], [0], [0], [1], [0, 0, 1, 1], [], []>} : vector<8x128xf32>, vector<128x64xf32>, vector<8x64xf32> -> vector<8x64xf32>
    %c1_131 = arith.constant 1 : index
    %c0_132 = arith.constant 0 : index
    %c0_133 = arith.constant 0 : index
    %271 = vector.load %arg16[%c1_131, %c0_132, %c0_133] : memref<2x1x64xf32, #tpu.memory_space<vmem>>, vector<1x1x64xf32>
    %272 = vector.shape_cast %271 : vector<1x1x64xf32> to vector<1x64xf32>
    %273 = vector.broadcast %272 : vector<1x64xf32> to vector<8x64xf32>
    %274 = arith.addf %270, %273 : vector<8x64xf32>
    %275 = arith.addf %274, %247 : vector<8x64xf32>
    %c1_134 = arith.constant 1 : index
    %c0_135 = arith.constant 0 : index
    %c0_136 = arith.constant 0 : index
    %276 = vector.load %arg17[%c1_134, %c0_135, %c0_136] : memref<2x1x64xf32, #tpu.memory_space<vmem>>, vector<1x1x64xf32>
    %277 = vector.shape_cast %276 : vector<1x1x64xf32> to vector<1x64xf32>
    %c1_137 = arith.constant 1 : index
    %c0_138 = arith.constant 0 : index
    %c0_139 = arith.constant 0 : index
    %278 = vector.load %arg18[%c1_137, %c0_138, %c0_139] : memref<2x1x64xf32, #tpu.memory_space<vmem>>, vector<1x1x64xf32>
    %279 = vector.shape_cast %278 : vector<1x1x64xf32> to vector<1x64xf32>
    %cst_140 = arith.constant dense<0.000000e+00> : vector<8xf32>
    %280 = vector.multi_reduction <add>, %275, %cst_140 [1] : vector<8x64xf32> to vector<8xf32>
    %281 = vector.shape_cast %280 : vector<8xf32> to vector<8x1xf32>
    %cst_141 = arith.constant 6.400000e+01 : f32
    %282 = vector.broadcast %cst_141 : f32 to vector<8x1xf32>
    %283 = arith.divf %281, %282 : vector<8x1xf32>
    %284 = vector.broadcast %283 : vector<8x1xf32> to vector<8x64xf32>
    %285 = arith.subf %275, %284 : vector<8x64xf32>
    %286 = arith.mulf %285, %285 : vector<8x64xf32>
    %cst_142 = arith.constant dense<0.000000e+00> : vector<8xf32>
    %287 = vector.multi_reduction <add>, %286, %cst_142 [1] : vector<8x64xf32> to vector<8xf32>
    %288 = vector.shape_cast %287 : vector<8xf32> to vector<8x1xf32>
    %cst_143 = arith.constant 6.400000e+01 : f32
    %289 = vector.broadcast %cst_143 : f32 to vector<8x1xf32>
    %290 = arith.divf %288, %289 : vector<8x1xf32>
    %cst_144 = arith.constant 9.99999996E-13 : f32
    %291 = vector.broadcast %cst_144 : f32 to vector<8x1xf32>
    %292 = arith.addf %290, %291 : vector<8x1xf32>
    %293 = math.rsqrt %292 : vector<8x1xf32>
    %294 = vector.broadcast %293 : vector<8x1xf32> to vector<8x64xf32>
    %295 = arith.mulf %285, %294 : vector<8x64xf32>
    %296 = vector.broadcast %277 : vector<1x64xf32> to vector<8x64xf32>
    %297 = arith.mulf %295, %296 : vector<8x64xf32>
    %298 = vector.broadcast %279 : vector<1x64xf32> to vector<8x64xf32>
    %299 = arith.addf %297, %298 : vector<8x64xf32>
    %c0_145 = arith.constant 0 : index
    %c0_146 = arith.constant 0 : index
    %300 = vector.load %arg19[%c0_145, %c0_146] : memref<64x128xf32, #tpu.memory_space<vmem>>, vector<64x128xf32>
    %cst_147 = arith.constant dense<0.000000e+00> : vector<8x128xf32>
    %301 = tpu.matmul %299, %300, %cst_147 {dimension_numbers = #tpu.dot_dimension_numbers<[1], [0], [0], [1], [0, 0, 1, 1], [], []>} : vector<8x64xf32>, vector<64x128xf32>, vector<8x128xf32> -> vector<8x128xf32>
    %c0_148 = arith.constant 0 : index
    %c0_149 = arith.constant 0 : index
    %302 = vector.load %arg20[%c0_148, %c0_149] : memref<1x128xf32, #tpu.memory_space<vmem>>, vector<1x128xf32>
    %303 = vector.broadcast %302 : vector<1x128xf32> to vector<8x128xf32>
    %304 = arith.addf %301, %303 : vector<8x128xf32>
    %305 = vector.extract_strided_slice %304 {offsets = [0, 0], sizes = [1, 128], strides = [1, 1]} : vector<8x128xf32> to vector<1x128xf32>
    %306 = vector.extract_strided_slice %305 {offsets = [0, 0], sizes = [1, 32], strides = [1, 1]} : vector<1x128xf32> to vector<1x32xf32>
    %307 = arith.negf %306 : vector<1x32xf32>
    %308 = math.exp %307 : vector<1x32xf32>
    %cst_150 = arith.constant 1.000000e+00 : f32
    %309 = vector.broadcast %cst_150 : f32 to vector<1x32xf32>
    %310 = arith.addf %309, %308 : vector<1x32xf32>
    %311 = arith.divf %309, %310 : vector<1x32xf32>
    %312 = vector.extract_strided_slice %305 {offsets = [0, 64], sizes = [1, 32], strides = [1, 1]} : vector<1x128xf32> to vector<1x32xf32>
    %313 = math.tanh %312 : vector<1x32xf32>
    %314 = vector.extract_strided_slice %305 {offsets = [0, 96], sizes = [1, 32], strides = [1, 1]} : vector<1x128xf32> to vector<1x32xf32>
    %315 = arith.negf %314 : vector<1x32xf32>
    %316 = math.exp %315 : vector<1x32xf32>
    %cst_151 = arith.constant 1.000000e+00 : f32
    %317 = vector.broadcast %cst_151 : f32 to vector<1x32xf32>
    %318 = arith.addf %317, %316 : vector<1x32xf32>
    %319 = arith.divf %317, %318 : vector<1x32xf32>
    %320 = arith.mulf %311, %313 : vector<1x32xf32>
    %321 = math.tanh %320 : vector<1x32xf32>
    %322 = arith.mulf %319, %321 : vector<1x32xf32>
    %c0_152 = arith.constant 0 : index
    %c0_153 = arith.constant 0 : index
    %323 = vector.load %arg21[%c0_152, %c0_153] : memref<32x128xf32, #tpu.memory_space<vmem>>, vector<32x128xf32>
    %cst_154 = arith.constant dense<0.000000e+00> : vector<1x128xf32>
    %324 = tpu.matmul %322, %323, %cst_154 {dimension_numbers = #tpu.dot_dimension_numbers<[1], [0], [0], [1], [0, 0, 1, 1], [], []>} : vector<1x32xf32>, vector<32x128xf32>, vector<1x128xf32> -> vector<1x128xf32>
    %c0_155 = arith.constant 0 : index
    %c0_156 = arith.constant 0 : index
    %325 = vector.load %arg22[%c0_155, %c0_156] : memref<1x128xf32, #tpu.memory_space<vmem>>, vector<1x128xf32>
    %326 = arith.addf %324, %325 : vector<1x128xf32>
    %c0_157 = arith.constant 0 : index
    %c0_158 = arith.constant 0 : index
    %c0_159 = arith.constant 0 : index
    %327 = vector.load %arg23[%c0_157, %c0_158, %c0_159] : memref<1x1x128xf32, #tpu.memory_space<vmem>>, vector<1x1x128xf32>
    %328 = vector.shape_cast %327 : vector<1x1x128xf32> to vector<1x128xf32>
    %329 = vector.shape_cast %326 : vector<1x128xf32> to vector<1x1x128xf32>
    tpu.vector_store %arg23[%c0_157, %c0_158, %c0_159], %329 {strides = array<i32>} : memref<1x1x128xf32, #tpu.memory_space<vmem>>, vector<1x1x128xf32>,
    return
  }
  func.func @transform_0(%arg0: i32) -> (i32, i32, i32) {
    %c0_i32 = arith.constant 0 : i32
    %c0_i32_0 = arith.constant 0 : i32
    %c0_i32_1 = arith.constant 0 : i32
    return %arg0, %c0_i32, %c0_i32_0 : i32, i32, i32
  }
  func.func @transform_1(%arg0: i32) -> (i32, i32) {
    %c0_i32 = arith.constant 0 : i32
    %c0_i32_0 = arith.constant 0 : i32
    %c0_i32_1 = arith.constant 0 : i32
    return %c0_i32, %c0_i32_0 : i32, i32
  }
  func.func @transform_2(%arg0: i32) -> (i32, i32, i32) {
    %c0_i32 = arith.constant 0 : i32
    %c0_i32_0 = arith.constant 0 : i32
    %c0_i32_1 = arith.constant 0 : i32
    return %arg0, %c0_i32, %c0_i32_0 : i32, i32, i32
  }
  func.func @transform_3(%arg0: i32) -> (i32, i32) {
    %c0_i32 = arith.constant 0 : i32
    %c0_i32_0 = arith.constant 0 : i32
    %c0_i32_1 = arith.constant 0 : i32
    return %c0_i32, %c0_i32_0 : i32, i32
  }
  func.func @transform_4(%arg0: i32) -> (i32, i32) {
    %c0_i32 = arith.constant 0 : i32
    %c0_i32_0 = arith.constant 0 : i32
    %c0_i32_1 = arith.constant 0 : i32
    return %c0_i32, %c0_i32_0 : i32, i32
  }
  func.func @transform_5(%arg0: i32) -> (i32, i32) {
    %c0_i32 = arith.constant 0 : i32
    %c0_i32_0 = arith.constant 0 : i32
    %c0_i32_1 = arith.constant 0 : i32
    return %c0_i32, %c0_i32_0 : i32, i32
  }
  func.func @transform_6(%arg0: i32) -> (i32, i32, i32) {
    %c0_i32 = arith.constant 0 : i32
    %c0_i32_0 = arith.constant 0 : i32
    %c0_i32_1 = arith.constant 0 : i32
    %c0_i32_2 = arith.constant 0 : i32
    return %c0_i32, %c0_i32_0, %c0_i32_1 : i32, i32, i32
  }
  func.func @transform_7(%arg0: i32) -> (i32, i32, i32) {
    %c0_i32 = arith.constant 0 : i32
    %c0_i32_0 = arith.constant 0 : i32
    %c0_i32_1 = arith.constant 0 : i32
    %c0_i32_2 = arith.constant 0 : i32
    return %c0_i32, %c0_i32_0, %c0_i32_1 : i32, i32, i32
  }
  func.func @transform_8(%arg0: i32) -> (i32, i32, i32) {
    %c0_i32 = arith.constant 0 : i32
    %c0_i32_0 = arith.constant 0 : i32
    %c0_i32_1 = arith.constant 0 : i32
    %c0_i32_2 = arith.constant 0 : i32
    return %c0_i32, %c0_i32_0, %c0_i32_1 : i32, i32, i32
  }
  func.func @transform_9(%arg0: i32) -> (i32, i32, i32) {
    %c0_i32 = arith.constant 0 : i32
    %c0_i32_0 = arith.constant 0 : i32
    %c0_i32_1 = arith.constant 0 : i32
    %c0_i32_2 = arith.constant 0 : i32
    return %c0_i32, %c0_i32_0, %c0_i32_1 : i32, i32, i32
  }
  func.func @transform_10(%arg0: i32) -> (i32, i32, i32) {
    %c0_i32 = arith.constant 0 : i32
    %c0_i32_0 = arith.constant 0 : i32
    %c0_i32_1 = arith.constant 0 : i32
    %c0_i32_2 = arith.constant 0 : i32
    return %c0_i32, %c0_i32_0, %c0_i32_1 : i32, i32, i32
  }
  func.func @transform_11(%arg0: i32) -> (i32, i32, i32) {
    %c0_i32 = arith.constant 0 : i32
    %c0_i32_0 = arith.constant 0 : i32
    %c0_i32_1 = arith.constant 0 : i32
    %c0_i32_2 = arith.constant 0 : i32
    return %c0_i32, %c0_i32_0, %c0_i32_1 : i32, i32, i32
  }
  func.func @transform_12(%arg0: i32) -> (i32, i32, i32) {
    %c0_i32 = arith.constant 0 : i32
    %c0_i32_0 = arith.constant 0 : i32
    %c0_i32_1 = arith.constant 0 : i32
    %c0_i32_2 = arith.constant 0 : i32
    return %c0_i32, %c0_i32_0, %c0_i32_1 : i32, i32, i32
  }
  func.func @transform_13(%arg0: i32) -> (i32, i32, i32) {
    %c0_i32 = arith.constant 0 : i32
    %c0_i32_0 = arith.constant 0 : i32
    %c0_i32_1 = arith.constant 0 : i32
    %c0_i32_2 = arith.constant 0 : i32
    return %c0_i32, %c0_i32_0, %c0_i32_1 : i32, i32, i32
  }
  func.func @transform_14(%arg0: i32) -> (i32, i32, i32) {
    %c0_i32 = arith.constant 0 : i32
    %c0_i32_0 = arith.constant 0 : i32
    %c0_i32_1 = arith.constant 0 : i32
    %c0_i32_2 = arith.constant 0 : i32
    return %c0_i32, %c0_i32_0, %c0_i32_1 : i32, i32, i32
  }
  func.func @transform_15(%arg0: i32) -> (i32, i32, i32) {
    %c0_i32 = arith.constant 0 : i32
    %c0_i32_0 = arith.constant 0 : i32
    %c0_i32_1 = arith.constant 0 : i32
    %c0_i32_2 = arith.constant 0 : i32
    return %c0_i32, %c0_i32_0, %c0_i32_1 : i32, i32, i32
  }
  func.func @transform_16(%arg0: i32) -> (i32, i32, i32) {
    %c0_i32 = arith.constant 0 : i32
    %c0_i32_0 = arith.constant 0 : i32
    %c0_i32_1 = arith.constant 0 : i32
    %c0_i32_2 = arith.constant 0 : i32
    return %c0_i32, %c0_i32_0, %c0_i32_1 : i32, i32, i32
  }
  func.func @transform_17(%arg0: i32) -> (i32, i32, i32) {
    %c0_i32 = arith.constant 0 : i32
    %c0_i32_0 = arith.constant 0 : i32
    %c0_i32_1 = arith.constant 0 : i32
    %c0_i32_2 = arith.constant 0 : i32
    return %c0_i32, %c0_i32_0, %c0_i32_1 : i32, i32, i32
  }
  func.func @transform_18(%arg0: i32) -> (i32, i32) {
    %c0_i32 = arith.constant 0 : i32
    %c0_i32_0 = arith.constant 0 : i32
    %c0_i32_1 = arith.constant 0 : i32
    return %c0_i32, %c0_i32_0 : i32, i32
  }
  func.func @transform_19(%arg0: i32) -> (i32, i32) {
    %c0_i32 = arith.constant 0 : i32
    %c0_i32_0 = arith.constant 0 : i32
    %c0_i32_1 = arith.constant 0 : i32
    return %c0_i32, %c0_i32_0 : i32, i32
  }
  func.func @transform_20(%arg0: i32) -> (i32, i32) {
    %c0_i32 = arith.constant 0 : i32
    %c0_i32_0 = arith.constant 0 : i32
    %c0_i32_1 = arith.constant 0 : i32
    return %c0_i32, %c0_i32_0 : i32, i32
  }
  func.func @transform_21(%arg0: i32) -> (i32, i32) {
    %c0_i32 = arith.constant 0 : i32
    %c0_i32_0 = arith.constant 0 : i32
    %c0_i32_1 = arith.constant 0 : i32
    return %c0_i32, %c0_i32_0 : i32, i32
  }
  func.func @transform_22(%arg0: i32) -> (i32, i32, i32) {
    %c0_i32 = arith.constant 0 : i32
    %c0_i32_0 = arith.constant 0 : i32
    %c0_i32_1 = arith.constant 0 : i32
    return %arg0, %c0_i32, %c0_i32_0 : i32, i32, i32
  }
}

</mosaic_0001>

<bundles_post_ra>
// kernel: model_forward.1
= control target key start
LH: loop header
LB: loop body
LE: loop exit
PB: predicated region body
PF: predicated region fallthrough
CT: control target
= control target key end

     0   :  { %s5172_s0 = inlined_call_operand.vmem [shape: f32[2,8,50], index: 0, kind: input, shape index: {}]   ;;  %s5173_s1 = inlined_call_operand.hbm [shape: f32[32,64], index: 1, kind: input, shape index: {}]   ;;  %s5174_s2 = inlined_call_operand.vmem [shape: f32[2,1,8], index: 2, kind: input, shape index: {}]   ;;  %s5175_s3 = inlined_call_operand.hbm [shape: f32[1,64], index: 3, kind: input, shape index: {}]   ;;  %s5176_s4 = inlined_call_operand.hbm [shape: f32[1,64], index: 4, kind: input, shape index: {}]   ;;  %s5177_s5 = inlined_call_operand.vmem [shape: f32[50,64], index: 5, kind: input, shape index: {}]   ;;  %s5178_s6 = inlined_call_operand.vmem [shape: f32[2,64,192], index: 6, kind: input, shape index: {}]   ;;  %s5179_s7 = inlined_call_operand.hbm [shape: f32[2,1,192], index: 7, kind: input, shape index: {}]   ;;  %s5180_s8 = inlined_call_operand.vmem [shape: f32[2,64,64], index: 8, kind: input, shape index: {}]   ;;  %s5181_s9 = inlined_call_operand.hbm [shape: f32[2,1,64], index: 9, kind: input, shape index: {}]   ;;  %s5182_s10 = inlined_call_operand.hbm [shape: f32[2,1,64], index: 10, kind: input, shape index: {}]   ;;  %s5183_s11 = inlined_call_operand.hbm [shape: f32[2,1,64], index: 11, kind: input, shape index: {}]   ;;  %s5184_s12 = inlined_call_operand.hbm [shape: f32[2,64,128], index: 12, kind: input, shape index: {}]   ;;  %s5185_s13 = inlined_call_operand.hbm [shape: f32[2,1,128], index: 13, kind: input, shape index: {}]   ;;  %s5186_s14 = inlined_call_operand.vmem [shape: f32[2,128,64], index: 14, kind: input, shape index: {}]   ;;  %s5187_s15 = inlined_call_operand.hbm [shape: f32[2,1,64], index: 15, kind: input, shape index: {}]   ;;  %s5188_s16 = inlined_call_operand.hbm [shape: f32[2,1,64], index: 16, kind: input, shape index: {}]   ;;  %s5189_s17 = inlined_call_operand.hbm [shape: f32[2,1,64], index: 17, kind: input, shape index: {}]   ;;  %s5190_s18 = inlined_call_operand.hbm [shape: f32[64,128], index: 18, kind: input, shape index: {}]   ;;  %s5191_s19 = inlined_call_operand.hbm [shape: f32[1,128], index: 19, kind: input, shape index: {}]   ;;  %s5192_s20 = inlined_call_operand.hbm [shape: f32[32,128], index: 20, kind: input, shape index: {}]   ;;  %s5193_s21 = inlined_call_operand.hbm [shape: f32[1,128], index: 21, kind: input, shape index: {}]   ;;  %s5194_s22 = inlined_call_operand.hbm [shape: f32[2,1,128], index: 22, kind: output, shape index: {}]  }
   0x1   :  { %5215 = sst [smem:[#allocation45_spill]] %s5172_s0 }
   0x2   :  { %5216 = sst [smem:[#allocation46_spill]] %s5173_s1 }
   0x3   :  { %5217 = sst [smem:[#allocation47_spill]] %s5174_s2 }
   0x4   :  { %5218 = sst [smem:[#allocation48_spill]] %s5175_s3 }
   0x5   :  { %5219 = sst [smem:[#allocation49_spill]] %s5176_s4 }
   0x6   :  { %5220 = sst [smem:[#allocation50_spill]] %s5177_s5 }
   0x7   :  { %5221 = sst [smem:[#allocation51_spill]] %s5178_s6 }
   0x8   :  { %5222 = sst [smem:[#allocation52_spill]] %s5179_s7 }
   0x9   :  { %5223 = sst [smem:[#allocation53_spill]] %s5182_s10 }
   0xa   :  { %5224 = sst [smem:[#allocation54_spill]] %s5184_s12 }
   0xb   :  { %5225 = sst [smem:[#allocation55_spill]] %s5194_s22 }
   0xc   :  { %27 = vsyncpa [#allocation3], 0 }
   0xd   :  { %28 = vsyncpa [#allocation6], 0 }
   0xe   :  { %29 = vsyncpa [#allocation9], 0 }
   0xf   :  { %30 = vsyncpa [#allocation12], 0 }
  0x10   :  { %31 = vsyncpa [#allocation15], 0 }
  0x11   :  { %32 = vsyncpa [#allocation18], 0 }
  0x12   :  { %33 = vsyncpa [#allocation21], 0 }
  0x13   :  { %34 = vsyncpa [#allocation24], 0 }
  0x14   :  { %35 = vsyncpa [#allocation27], 0 }
  0x15   :  { %36 = vsyncpa [#allocation4], 0 }
  0x16   :  { %38 = vsyncpa [#allocation4 + $0x1], 0  ;;  %s4395_s3 = smov 0   ;;  %s4397_s28 = smov 0  }
  0x17   :  { %s4399_s29 = smov 0   ;;  %s4401_s30 = smov 0  }
  0x18 LB: > { %5226 = sst [smem:[#allocation39_spill]] %s4238_s3  ;;  %s4416_s4 = sadd.s32 4294967295, %s4250_s30   ;;  %s4250_s30 = sphi %s4401_s30, %s5276_s30   ;;  %s4246_s29 = sphi %s4399_s29, %s5278_s29   ;;  %s4242_s28 = sphi %s4397_s28, %s5280_s28   ;;  %s4238_s3 = sphi %s4395_s3, %s5279_s3  }
  0x19   : > { %5227 = sst [smem:[#allocation40_spill]] %s4246_s29  ;;  %s3027_s0 = sadd.s32 4294967294, %s4250_s30  }
  0x1a   : > { %5228 = sst [smem:[#allocation41_spill]] %s4250_s30  ;;  %s4420_s23 = sadd.s32 1, %s4250_s30  }
  0x1b   : > { %5229 = sst [smem:[#allocation42_spill]] %s4420_s23  ;;  %s523_s1 = sadd.s32 1, %s4246_s29 }
  0x1c   : > { %s520_s5 = ssub.s32 %s4250_s30, %s4420_s23  ;;  %p533_p0 = scmp.ne.s32.totalorder %s4246_s29, %s4242_s28 }
  0x1d   : > { %p521_p1 = scmp.eq.s32.totalorder %s520_s5, 0  ;;  %p534_p2 = scmp.eq.s32.totalorder %s4416_s4, 1 }
  0x1e   : > { %p539_p3 = scmp.ne.s32.totalorder %s4242_s28, %s4238_s3  ;;  %p540_p4 = scmp.eq.s32.totalorder %s3027_s0, 1 }
  0x1f   : > { %s4431_s24 = scalar_select %p521_p1, %s4246_s29, %s523_s1  }
  0x20   : > { %p4433_p5 = por %p534_p2, %p533_p0  ;;  %p4437_p6 = por %p540_p4, %p539_p3 }
  0x21   : > { %5230 = sst [smem:[#allocation43_spill]] %s4431_s24  ;;  %p3028_p7 = scmp.ge.s32.totalorder %s4250_s30, 1 }
  0x22   : > { %s5231_s6 = scalar_select %p4433_p5, 1, 0 }
  0x23   : > { %s5232_s25 = scalar_select %p4437_p6, 1, 0 }
  0x24   : > { %p547_p8 = scmp.lt.s32.totalorder %s4250_s30, 3  ;;  %p5202_p9 = scmp.eq.s32.totalorder %s4416_s4, 0 }
  0x25   : > { %5233 = sst [smem:[#allocation44_spill]] %s5232_s25  ;;  %s4252_s2 = smov [#allocation5]  }
  0x26   : > { %p4444_p10 = pnand %p3028_p7, %p547_p8  ;;  %s573_s27 = sshll.u32 %s4252_s2, 4  ;;  %s574_s27 = int_to_ptr.vmem [resolvable:$true] %s573_s27 }
  0x27   : > { %s4253_s0 = smov [#allocation8]   ;;  %s3749_s29 = scalar_lea.vmem %s574_s27, 16 }
  0x28   : > { %s5234_s26 = scalar_select %p4444_p10, 1, 0 }
  0x29   : > { %p3555_p11 = pneg %p4444_p10  ;;  %s600_s1 = sshll.u32 %s4253_s0, 4  ;;  %s601_s1 = int_to_ptr.vmem [resolvable:$true] %s600_s1 }
  0x2a   : > { %p3750_p0 = scmp.ne.s32.totalorder %s574_s27, %s3749_s29  ;;  %s3756_s2 = scalar_lea.vmem %s574_s27, 32 }
  0x2b   : > { %p4452_p12 = pnand %p5202_p9, %p3555_p11  ;;  %p3757_p3 = scmp.lt.s32.totalorder %s574_s27, %s574_s27 }
  0x2c   : > { %p3758_p4 = scmp.lt.s32.totalorder %s3756_s2, %s3749_s29 }
  0x2d   : > { %p4458_p13 = pneg %p4452_p12 }
  0x2e   : > { %p3759_p7 = por %p3758_p4, %p3757_p3 }
  0x2f   : > { %p3752_p1 = pnand %p3750_p0, %p4458_p13 }
  0x31   : > { %p3753_p2 = pneg %p3752_p1 }
  0x33   : > { %p3760_p8 = pnand %p3759_p7, %p3753_p2 }
  0x35   : > { %3763 = shalt.err (!%p3760_p8)
}
  0x36   : > { %s5237_s25 = sld [smem:[#allocation48_spill]]  ;;  %s3775_s3 = scalar_lea.vmem %s601_s1, 64 }
  0x37   : > { %p3776_p11 = scmp.ne.s32.totalorder %s601_s1, %s3775_s3  ;;  %p3783_p0 = scmp.lt.s32.totalorder %s601_s1, %s601_s1 }
  0x38   : > { %p3784_p1 = scmp.lt.s32.totalorder %s3775_s3, %s3775_s3 }
  0x39   : > { %p3778_p9 = pnand %p3776_p11, %p4458_p13 }
  0x3a   : > { %p3785_p5 = por %p3784_p1, %p3783_p0 }
  0x3b   : > { %p3779_p6 = pneg %p3778_p9 }
  0x3c   : > { %3561 = dma.hbm_to_vmem [thread:$0]  (!%p4452_p12), %s5237_s25, 16, %s574_s27, [#allocation6]  }
  0x3d   : > { %p3786_p10 = pnand %p3785_p5, %p3779_p6 }
  0x3f   : > { %3789 = shalt.err (!%p3786_p10)
}
  0x40   : > { %s4254_s29 = smov 32   ;;  %s4255_s2 = smov 2  }
  0x41   : > { %s5238_s7 = sld [smem:[#allocation52_spill]]  ;;  %s4256_s23 = smov [#allocation11]  }
  0x42   : > { %s629_s25 = sshll.u32 %s4256_s23, 4  ;;  %s630_s25 = int_to_ptr.vmem [resolvable:$true] %s629_s25 }
  0x43   : > { %s3801_s27 = scalar_lea.vmem %s630_s25, 32  ;;  %p3809_p4 = scmp.lt.s32.totalorder %s630_s25, %s630_s25 }
  0x44   : > { %p3802_p2 = scmp.ne.s32.totalorder %s630_s25, %s3801_s27  ;;  %p3810_p5 = scmp.lt.s32.totalorder %s3801_s27, %s3801_s27 }
  0x46   : > { %p3804_p9 = pnand %p3802_p2, %p4458_p13  ;;  %p3811_p6 = por %p3810_p5, %p3809_p4 }
  0x47   : > { %3567 = dma.hbm_to_vmem [thread:$0]  (!%p4452_p12), %s5238_s7, 64, %s601_s1, [#allocation9], %s4254_s29, %s4254_s29, %s4255_s2  }
  0x48   : > { %p3805_p3 = pneg %p3804_p9 }
  0x4a   : > { %p3812_p10 = pnand %p3811_p6, %p3805_p3 }
  0x4c   : > { %3815 = shalt.err (!%p3812_p10)
}
  0x4d   : > { %s5211_s3 = smov 16   ;;  %s5213_s0 = smov 1  }
  0x4e   : > { %s5239_s10 = sld [smem:[#allocation53_spill]]  ;;  %s4259_s1 = smov [#allocation14]  }
  0x4f   : > { %s655_s29 = sshll.u32 %s4259_s1, 4  ;;  %s4260_s2 = smov [#allocation17]   ;;  %s656_s29 = int_to_ptr.vmem [resolvable:$true] %s655_s29 }
  0x50   : > { %s684_s23 = sshll.u32 %s4260_s2, 4  ;;  %s3827_s27 = scalar_lea.vmem %s656_s29, 2048  ;;  %s685_s23 = int_to_ptr.vmem [resolvable:$true] %s684_s23 }
  0x51   : > { %p3828_p7 = scmp.ne.s32.totalorder %s656_s29, %s3827_s27  ;;  %p3835_p0 = scmp.lt.s32.totalorder %s656_s29, %s656_s29 }
  0x52   : > { %p3836_p1 = scmp.lt.s32.totalorder %s3827_s27, %s3827_s27 }
  0x53   : > { %p3830_p8 = pnand %p3828_p7, %p4458_p13 }
  0x54   : > { %3573 = dma.hbm_to_vmem [thread:$0]  (!%p4452_p12), %s5239_s10, 32, %s630_s25, [#allocation12], %s5211_s3, %s5211_s3, %s5213_s0  }
  0x55   : > { %p3831_p11 = pneg %p3830_p8  ;;  %p3837_p2 = por %p3836_p1, %p3835_p0 }
  0x57   : > { %p3838_p9 = pnand %p3837_p2, %p3831_p11 }
  0x59   : > { %3841 = shalt.err (!%p3838_p9)
}
  0x5a   : > { %s5207_s7 = smov 128   ;;  %s5209_s22 = smov 8  }
  0x5b   : > { %s5240_s12 = sld [smem:[#allocation54_spill]]  ;;  %s3853_s1 = scalar_lea.vmem %s685_s23, 32 }
  0x5c   : > { %p3854_p3 = scmp.ne.s32.totalorder %s685_s23, %s3853_s1  ;;  %p3861_p6 = scmp.lt.s32.totalorder %s685_s23, %s685_s23 }
  0x5d   : > { %p3862_p10 = scmp.lt.s32.totalorder %s3853_s1, %s3853_s1 }
  0x5e   : > { %p3856_p4 = pnand %p3854_p3, %p4458_p13 }
  0x5f   : > { %p3863_p7 = por %p3862_p10, %p3861_p6 }
  0x60   : > { %p3857_p5 = pneg %p3856_p4 }
  0x61   : > { %3579 = dma.hbm_to_vmem [thread:$0]  (!%p4452_p12), %s5240_s12, 2048, %s656_s29, [#allocation15], %s5207_s7, %s5207_s7, %s5209_s22  }
  0x62   : > { %p3864_p8 = pnand %p3863_p7, %p3857_p5 }
  0x64   : > { %3867 = shalt.err (!%p3864_p8)
}
  0x65   : > { %3585 = dma.hbm_to_vmem [thread:$0]  (!%p4452_p12), %s5187_s15, 32, %s685_s23, [#allocation18], %s5211_s3, %s5211_s3, %s5213_s0  }
  0x66   : > { %s4263_s29 = smov [#allocation20]   ;;  %s4264_s30 = smov [#allocation23]  }
  0x67   : > { %s710_s25 = sshll.u32 %s4263_s29, 4  ;;  %s737_s7 = sshll.u32 %s4264_s30, 4  ;;  %s711_s25 = int_to_ptr.vmem [resolvable:$true] %s710_s25  ;;  %s738_s7 = int_to_ptr.vmem [resolvable:$true] %s737_s7 }
  0x68   : > { %s3879_s22 = scalar_lea.vmem %s711_s25, 32  ;;  %p3887_p2 = scmp.lt.s32.totalorder %s711_s25, %s711_s25 }
  0x69   : > { %p3880_p11 = scmp.ne.s32.totalorder %s711_s25, %s3879_s22  ;;  %p3888_p9 = scmp.lt.s32.totalorder %s3879_s22, %s3879_s22 }
  0x6b   : > { %p3882_p0 = pnand %p3880_p11, %p4458_p13  ;;  %p3889_p3 = por %p3888_p9, %p3887_p2 }
  0x6d   : > { %p3883_p1 = pneg %p3882_p0 }
  0x6f   : > { %p3890_p4 = pnand %p3889_p3, %p3883_p1 }
  0x71   : > { %3893 = shalt.err (!%p3890_p4)
}
  0x72   : > { %3591 = dma.hbm_to_vmem [thread:$0]  (!%p4452_p12), %s5189_s17, 32, %s711_s25, [#allocation21], %s5211_s3, %s5211_s3, %s5213_s0  }
  0x73   : > { %s3905_s2 = scalar_lea.vmem %s738_s7, 16  ;;  %s3912_s22 = scalar_lea.vmem %s738_s7, 32 }
  0x74   : > { %p3906_p5 = scmp.ne.s32.totalorder %s738_s7, %s3905_s2  ;;  %p3913_p7 = scmp.lt.s32.totalorder %s738_s7, %s738_s7 }
  0x75   : > { %p3914_p8 = scmp.lt.s32.totalorder %s3912_s22, %s3905_s2 }
  0x76   : > { %p3908_p6 = pnand %p3906_p5, %p4458_p13 }
  0x77   : > { %p3915_p11 = por %p3914_p8, %p3913_p7 }
  0x78   : > { %p3909_p10 = pneg %p3908_p6 }
  0x7a   : > { %p3916_p0 = pnand %p3915_p11, %p3909_p10 }
  0x7c   : > { %3919 = shalt.err (!%p3916_p0)
}
  0x7d   : > { %3597 = dma.hbm_to_vmem [thread:$0]  (!%p4452_p12), %s5191_s19, 16, %s738_s7, [#allocation24]  }
  0x7e   : > { %s4265_s25 = smov [#allocation2]   ;;  %s4266_s23 = smov [#allocation7]  }
  0x7f   : > { %s559_s30 = sshll.u32 %s4265_s25, 4  ;;  %s584_s1 = sshll.u32 %s4266_s23, 4  ;;  %s560_s30 = int_to_ptr.vmem [resolvable:$true] %s559_s30  ;;  %s585_s1 = int_to_ptr.vmem [resolvable:$true] %s584_s1 }
  0x80   : > { %s3931_s3 = scalar_lea.vmem %s560_s30, 512  ;;  %p3939_p3 = scmp.lt.s32.totalorder %s560_s30, %s560_s30 }
  0x81   : > { %p3932_p1 = scmp.ne.s32.totalorder %s560_s30, %s3931_s3  ;;  %p3940_p4 = scmp.lt.s32.totalorder %s3931_s3, %s3931_s3 }
  0x83   : > { %p3934_p2 = pnand %p3932_p1, %p4458_p13  ;;  %p3941_p5 = por %p3940_p4, %p3939_p3 }
  0x85   : > { %p3935_p9 = pneg %p3934_p2 }
  0x87   : > { %p3942_p6 = pnand %p3941_p5, %p3935_p9 }
  0x89   : > { %3945 = shalt.err (!%p3942_p6)
}
  0x8a   : > { %s5241_s2 = smov 8   ;;  %s5242_s22 = smov 128  }
  0x8b   : > { %s5243_s29 = sld [smem:[#allocation46_spill]]  ;;  %s3957_s25 = scalar_lea.vmem %s585_s1, 16 }
  0x8c   : > { %p3958_p10 = scmp.ne.s32.totalorder %s585_s1, %s3957_s25  ;;  %s3964_s3 = scalar_lea.vmem %s585_s1, 32 }
  0x8d   : > { %p3965_p11 = scmp.lt.s32.totalorder %s585_s1, %s585_s1  ;;  %p3966_p0 = scmp.lt.s32.totalorder %s3964_s3, %s3957_s25 }
  0x8e   : > { %p3960_p7 = pnand %p3958_p10, %p4458_p13 }
  0x8f   : > { %p3967_p1 = por %p3966_p0, %p3965_p11 }
  0x90   : > { %p3961_p8 = pneg %p3960_p7 }
  0x91   : > { %3558 = dma.hbm_to_vmem [thread:$0]  (!%p4452_p12), %s5243_s29, 512, %s560_s30, [#allocation3], %s5242_s22, %s5242_s22, %s5241_s2  }
  0x92   : > { %p3968_p2 = pnand %p3967_p1, %p3961_p8 }
  0x94   : > { %3971 = shalt.err (!%p3968_p2)
}
  0x95   : > { %s5244_s10 = sld [smem:[#allocation49_spill]]  ;;  %s4267_s30 = smov [#allocation10]  }
  0x96   : > { %s616_s7 = sshll.u32 %s4267_s30, 4  ;;  %s4268_s27 = smov [#allocation13]   ;;  %s617_s7 = int_to_ptr.vmem [resolvable:$true] %s616_s7 }
  0x97   : > { %s642_s29 = sshll.u32 %s4268_s27, 4  ;;  %s3983_s12 = scalar_lea.vmem %s617_s7, 32  ;;  %s643_s29 = int_to_ptr.vmem [resolvable:$true] %s642_s29 }
  0x98   : > { %p3984_p9 = scmp.ne.s32.totalorder %s617_s7, %s3983_s12  ;;  %p3991_p5 = scmp.lt.s32.totalorder %s617_s7, %s617_s7 }
  0x99   : > { %p3992_p6 = scmp.lt.s32.totalorder %s3983_s12, %s3983_s12 }
  0x9a   : > { %p3986_p3 = pnand %p3984_p9, %p4458_p13 }
  0x9b   : > { %3564 = dma.hbm_to_vmem [thread:$0]  (!%p4452_p12), %s5244_s10, 16, %s585_s1, [#allocation6]  }
  0x9c   : > { %p3987_p4 = pneg %p3986_p3  ;;  %p3993_p10 = por %p3992_p6, %p3991_p5 }
  0x9e   : > { %p3994_p7 = pnand %p3993_p10, %p3987_p4 }
  0xa0   : > { %3997 = shalt.err (!%p3994_p7)
}
  0xa1   : > { %s5245_s0 = smov 1   ;;  %s5246_s25 = smov 16  }
  0xa2   : > { %3570 = dma.hbm_to_vmem [thread:$0]  (!%p4452_p12), %s5181_s9, 32, %s617_s7, [#allocation9], %s5246_s25, %s5246_s25, %s5245_s0  }
  0xa3   : > { %s4009_s3 = scalar_lea.vmem %s643_s29, 32  ;;  %p4017_p1 = scmp.lt.s32.totalorder %s643_s29, %s643_s29 }
  0xa4   : > { %p4010_p8 = scmp.ne.s32.totalorder %s643_s29, %s4009_s3  ;;  %p4018_p2 = scmp.lt.s32.totalorder %s4009_s3, %s4009_s3 }
  0xa6   : > { %p4012_p11 = pnand %p4010_p8, %p4458_p13  ;;  %p4019_p9 = por %p4018_p2, %p4017_p1 }
  0xa8   : > { %p4013_p0 = pneg %p4012_p11 }
  0xaa   : > { %p4020_p3 = pnand %p4019_p9, %p4013_p0 }
  0xac   : > { %4023 = shalt.err (!%p4020_p3)
}
  0xad   : > { %3576 = dma.hbm_to_vmem [thread:$0]  (!%p4452_p12), %s5183_s11, 32, %s643_s29, [#allocation12], %s5246_s25, %s5246_s25, %s5245_s0  }
  0xae   : > { %s4269_s30 = smov [#allocation16]   ;;  %s4270_s27 = smov [#allocation19]  }
  0xaf   : > { %s668_s7 = sshll.u32 %s4269_s30, 4  ;;  %s697_s10 = sshll.u32 %s4270_s27, 4  ;;  %s669_s7 = int_to_ptr.vmem [resolvable:$true] %s668_s7  ;;  %s698_s10 = int_to_ptr.vmem [resolvable:$true] %s697_s10 }
  0xb0   : > { %s4035_s1 = scalar_lea.vmem %s669_s7, 32  ;;  %p4043_p10 = scmp.lt.s32.totalorder %s669_s7, %s669_s7 }
  0xb1   : > { %p4036_p4 = scmp.ne.s32.totalorder %s669_s7, %s4035_s1  ;;  %p4044_p7 = scmp.lt.s32.totalorder %s4035_s1, %s4035_s1 }
  0xb3   : > { %p4038_p5 = pnand %p4036_p4, %p4458_p13  ;;  %p4045_p8 = por %p4044_p7, %p4043_p10 }
  0xb5   : > { %p4039_p6 = pneg %p4038_p5 }
  0xb7   : > { %p4046_p11 = pnand %p4045_p8, %p4039_p6 }
  0xb9   : > { %4049 = shalt.err (!%p4046_p11)
}
  0xba   : > { %3582 = dma.hbm_to_vmem [thread:$0]  (!%p4452_p12), %s5185_s13, 32, %s669_s7, [#allocation15], %s5246_s25, %s5246_s25, %s5245_s0  }
  0xbb   : > { %s4061_s12 = scalar_lea.vmem %s698_s10, 32  ;;  %p4069_p9 = scmp.lt.s32.totalorder %s698_s10, %s698_s10 }
  0xbc   : > { %p4062_p0 = scmp.ne.s32.totalorder %s698_s10, %s4061_s12  ;;  %p4070_p3 = scmp.lt.s32.totalorder %s4061_s12, %s4061_s12 }
  0xbe   : > { %p4064_p1 = pnand %p4062_p0, %p4458_p13  ;;  %p4071_p4 = por %p4070_p3, %p4069_p9 }
  0xc0   : > { %p4065_p2 = pneg %p4064_p1 }
  0xc2   : > { %p4072_p5 = pnand %p4071_p4, %p4065_p2 }
  0xc4   : > { %4075 = shalt.err (!%p4072_p5)
}
  0xc5   : > { %3588 = dma.hbm_to_vmem [thread:$0]  (!%p4452_p12), %s5188_s16, 32, %s698_s10, [#allocation18], %s5246_s25, %s5246_s25, %s5245_s0  }
  0xc6   : > { %s4271_s7 = smov [#allocation22]   ;;  %s4272_s1 = smov [#allocation25]  }
  0xc7   : > { %s723_s27 = sshll.u32 %s4271_s7, 4  ;;  %s747_s29 = sshll.u32 %s4272_s1, 4  ;;  %s724_s27 = int_to_ptr.vmem [resolvable:$true] %s723_s27  ;;  %s748_s29 = int_to_ptr.vmem [resolvable:$true] %s747_s29 }
  0xc8   : > { %s4087_s3 = scalar_lea.vmem %s724_s27, 1024  ;;  %p4095_p8 = scmp.lt.s32.totalorder %s724_s27, %s724_s27 }
  0xc9   : > { %p4088_p6 = scmp.ne.s32.totalorder %s724_s27, %s4087_s3  ;;  %p4096_p11 = scmp.lt.s32.totalorder %s4087_s3, %s4087_s3 }
  0xcb   : > { %p4090_p10 = pnand %p4088_p6, %p4458_p13  ;;  %p4097_p0 = por %p4096_p11, %p4095_p8 }
  0xcd   : > { %p4091_p7 = pneg %p4090_p10 }
  0xcf   : > { %p4098_p1 = pnand %p4097_p0, %p4091_p7 }
  0xd1   : > { %4101 = shalt.err (!%p4098_p1)
}
  0xd2   : > { %3594 = dma.hbm_to_vmem [thread:$0]  (!%p4452_p12), %s5190_s18, 1024, %s724_s27, [#allocation21], %s5242_s22, %s5242_s22, %s5241_s2  }
  0xd3   : > { %s4113_s10 = scalar_lea.vmem %s748_s29, 512  ;;  %p4121_p4 = scmp.lt.s32.totalorder %s748_s29, %s748_s29 }
  0xd4   : > { %p4114_p2 = scmp.ne.s32.totalorder %s748_s29, %s4113_s10  ;;  %p4122_p5 = scmp.lt.s32.totalorder %s4113_s10, %s4113_s10 }
  0xd6   : > { %p4116_p9 = pnand %p4114_p2, %p4458_p13  ;;  %p4123_p6 = por %p4122_p5, %p4121_p4 }
  0xd8   : > { %p4117_p3 = pneg %p4116_p9 }
  0xda   : > { %p4124_p10 = pnand %p4123_p6, %p4117_p3 }
  0xdc   : > { %4127 = shalt.err (!%p4124_p10)
}
  0xdd   : > { %3600 = dma.hbm_to_vmem [thread:$0]  (!%p4452_p12), %s5192_s20, 512, %s748_s29, [#allocation24], %s5242_s22, %s5242_s22, %s5241_s2  }
  0xde   : > { %s4273_s30 = smov [#allocation26]  }
  0xdf   : > { %s761_s7 = sshll.u32 %s4273_s30, 4  ;;  %s762_s7 = int_to_ptr.vmem [resolvable:$true] %s761_s7 }
  0xe0   : > { %s4139_s27 = scalar_lea.vmem %s762_s7, 16  ;;  %s4146_s1 = scalar_lea.vmem %s762_s7, 32 }
  0xe1   : > { %p4140_p7 = scmp.ne.s32.totalorder %s762_s7, %s4139_s27  ;;  %p4147_p0 = scmp.lt.s32.totalorder %s762_s7, %s762_s7 }
  0xe2   : > { %p4148_p1 = scmp.lt.s32.totalorder %s4146_s1, %s4139_s27 }
  0xe3   : > { %p4142_p8 = pnand %p4140_p7, %p4458_p13 }
  0xe4   : > { %p4149_p2 = por %p4148_p1, %p4147_p0 }
  0xe5   : > { %p4143_p11 = pneg %p4142_p8 }
  0xe7   : > { %p4150_p9 = pnand %p4149_p2, %p4143_p11 }
  0xe9   : > { %4153 = shalt.err (!%p4150_p9)
}
  0xea   : > { %3603 = dma.hbm_to_vmem [thread:$0]  (!%p4452_p12), %s5193_s21, 16, %s762_s7, [#allocation27]  }
  0xeb   : > { %p5247_p3 = scmp.ne.s32.totalorder %s5234_s26, 0 }
  0xec   : > { %p5248_p4 = scmp.eq.s32.totalorder (!%p5247_p3), %s4416_s4, 0 }
  0xed   : > { %787 = sbr.rel (%p5247_p3) target bundleno = 6817 (0x1aa1), region = 108 }
  0xf2   : > { %4197 = dma.done.wait (%p5248_p4), [#allocation3], 512   ;;  %p5249_p13 = pmov %p5248_p4 }
  0xf3   : > { %p5250_p5 = pmov %p5248_p4 }
  0xf4   : > { %4199 = vsyncadd (%p5249_p13), [#allocation3], 4294966784 }
  0xf5   : > { %4201 = dma.done.wait (%p5250_p5), [#allocation6], 32   ;;  %p5251_p6 = pmov %p5248_p4 }
  0xf6   : > { %p5252_p10 = pmov %p5248_p4 }
  0xf7   : > { %4203 = vsyncadd (%p5251_p6), [#allocation6], 4294967264 }
  0xf8   : > { %4205 = dma.done.wait (%p5252_p10), [#allocation9], 96   ;;  %p5253_p12 = pmov %p5248_p4 }
  0xf9   : > { %p5254_p7 = pmov %p5248_p4 }
  0xfa   : > { %4207 = vsyncadd (%p5253_p12), [#allocation9], 4294967200 }
  0xfb   : > { %4209 = dma.done.wait (%p5254_p7), [#allocation12], 64   ;;  %p5255_p8 = pmov %p5248_p4 }
  0xfc   : > { %p5256_p11 = pmov %p5248_p4 }
  0xfd   : > { %4211 = vsyncadd (%p5255_p8), [#allocation12], 4294967232 }
  0xfe   : > { %4213 = dma.done.wait (%p5256_p11), [#allocation15], 2080   ;;  %p5257_p0 = pmov %p5248_p4 }
 0x100   : > { %4215 = vsyncadd (%p5257_p0), [#allocation15], 4294965216  ;;  %p5258_p1 = pmov %p5257_p0 }
 0x101   : > { %p5259_p2 = pmov %p5257_p0 }
 0x102   : > { %4217 = dma.done.wait (%p5258_p1), [#allocation18], 64  }
 0x103   : > { %4219 = vsyncadd (%p5259_p2), [#allocation18], 4294967232  ;;  %p5260_p9 = pmov %p5257_p0 }
 0x104   : > { %p5261_p3 = pmov %p5257_p0 }
 0x105   : > { %4221 = dma.done.wait (%p5260_p9), [#allocation21], 1056  }
 0x106   : > { %4223 = vsyncadd (%p5261_p3), [#allocation21], 4294966240  ;;  %p5262_p4 = pmov %p5257_p0 }
 0x107   : > { %p5263_p13 = pmov %p5257_p0 }
 0x108   : > { %4225 = dma.done.wait (%p5262_p4), [#allocation24], 528  }
 0x109   : > { %4227 = vsyncadd (%p5263_p13), [#allocation24], 4294966768  ;;  %p5264_p5 = pmov %p5257_p0 }
 0x10a   : > { %p5265_p6 = pmov %p5257_p0 }
 0x10b   : > { %4229 = dma.done.wait (%p5264_p5), [#allocation27], 16  }
 0x10c   : > { %4231 = vsyncadd (%p5265_p6), [#allocation27], 4294967280  ;;  %v4274_v0 = vmov 0.0   ;;  %vm4275_vm0 = vmmov 0   ;;  %p910_p10 = scmp.lt.s32.totalorder %s4416_s4, 1  ;;  %vm930_vm1 = vcmask 1041408   ;;  %v1054_v44 = vlaneseq }
 0x10d   : > { %3256 = vmatprep.subr.mxu0 %v4274_v0  ;;  %3270 = vmatprep.mubr.msk.f32.mxu0 %vm4275_vm0, %v4274_v0  ;;  %s5266_s5 = sld [smem:[#allocation50_spill]]  ;;  %vm926_vm2 = vcmask 408576   ;;  %v925_v9 = vld [vmem:[#allocation2] sm:$0xff]  ;;  %vm1006_vm3 = vcmask 523264   ;;  %s4276_s3 = smov 96   ;;  %vm1141_vm4 = vcmask 261120  }
 0x10e   : > { %1131 = vmatprep.mubr.f32.mxu1 %v4274_v0  ;;  %s4657_s29 = scalar_select %p910_p10, %s4416_s4, 1  ;;  %v3066_v39 = vld [vmem:[#allocation5] ss:$0 sm:$0xff]  ;;  %v3067_v41 = vld [vmem:[#allocation7] ss:$0 sm:$0xff]  ;;  %v4744_v45 = vshrl.u32 %v1054_v44, 7 }
 0x10f   : > { %s5267_s26 = sld [smem:[#allocation45_spill]]  ;;  %v1052_v47 = vld [vmem:[#allocation8] sm:$0x3]  ;;  %s4277_s0 = smov 64   ;;  %vm1224_vm5 = vcmask 64512  }
 0x110   : > { %s3063_s30 = sshll.u32 %s4657_s29, 3  ;;  %s5268_s23 = sld [smem:[#allocation51_spill]]  ;;  %v1056_v46 = vsub.s32 0, %v4744_v45  ;;  %v1060_v51 = vsub.s32 1, %v4744_v45 }
 0x111   : > { %s4278_s24 = smov 32   ;;  %s5269_s22 = sld [smem:[#allocation47_spill]] }
 0x112   : > { %v1057_v48 = vrot.slane %v1052_v47, %v1056_v46  ;;  %v1061_v52 = vrot.slane %v1052_v47, %v1060_v51  ;;  %s5270_s10 = sld [smem:[#allocation55_spill]]  ;;  %p5271_p7 = scmp.ne.s32.totalorder %s5231_s6, 0 }
 0x113   : > { %v924_v1 = vld [vmem:[%s5266_s5 + $0x30] sm:$0x3]  ;;  %v923_v2 = vld [vmem:[%s5266_s5 + $0x28] sm:$0xff]  ;;  %v922_v3 = vld [vmem:[%s5266_s5 + $0x20] sm:$0xff] }
 0x114   : > { %3257 = vmatpush3.msk.msra.mxu0 %vm930_vm1, %v924_v1  ;;  %v921_v4 = vld [vmem:[%s5266_s5 + $0x18] sm:$0xff]  ;;  %v920_v5 = vld [vmem:[%s5266_s5 + $0x10] sm:$0xff]  ;;  %v919_v6 = vld [vmem:[%s5266_s5 + $0x8] sm:$0xff] }
 0x115   : > { %3258 = vmatprep.subr.mxu0 %v4274_v0  ;;  %s913_s2 = scalar_lea.vmem %s5267_s26, %s3063_s30  ;;  %v918_v7 = vld [vmem:[%s5266_s5] sm:$0xff]  ;;  %s3145_s26 = sshll.u32 %s4416_s4, 4 }
 0x116   : > { %3259 = vmatpush3.msra.mxu0 %v923_v2  ;;  %v917_v8 = vld [vmem:[%s913_s2] sm:$0xff]  ;;  %v1051_v19 = vld [vmem:[%s5268_s23 + $0x78] sm:$0xff]  ;;  %v1050_v20 = vld [vmem:[%s5268_s23 + $0x70] sm:$0xff]  ;;  %s4279_s30 = smov [#allocation28]  }
 0x117   : > { %3260 = vmatprep.subr.mxu0 %v4274_v0  ;;  %v1049_v21 = vld [vmem:[%s5268_s23 + $0x68] sm:$0xff]  ;;  %1083 = vmatprep.subr.mxu1 %v1051_v19  ;;  %v1048_v22 = vld [vmem:[%s5268_s23 + $0x60] sm:$0xff]  ;;  %v1047_v23 = vld [vmem:[%s5268_s23 + $0x58] sm:$0xff]  ;;  %s916_s25 = scalar_lea.vmem %s5269_s22, %s4657_s29  ;;  %s4158_s4 = sshll.u32 %s4279_s30, 4  ;;  %s4159_s4 = int_to_ptr.vmem [resolvable:$false] %s4158_s4 }
 0x118   : > { %3261 = vmatpush3.msra.mxu0 %v922_v3  ;;  %1084 = vmatpush1.msra.mxu1 %v1050_v20  ;;  %v1046_v24 = vld [vmem:[%s5268_s23 + $0x50] sm:$0xff]  ;;  %v1045_v25 = vld [vmem:[%s5268_s23 + $0x48] sm:$0xff]  ;;  %v1044_v26 = vld [vmem:[%s5268_s23 + $0x40] sm:$0xff]  ;;  %s5137_s12 = scalar_lea.hbm %s5270_s10, %s3145_s26  ;;  %s4160_s7 = scalar_lea.vmem %s4159_s4, 32 }
 0x119   : > { %3262 = vmatprep.subr.mxu0 %v4274_v0  ;;  %1085 = vmatprep.subr.mxu1 %v1049_v21  ;;  %v1043_v27 = vld [vmem:[%s5268_s23 + $0x38] sm:$0xff]  ;;  %v1042_v28 = vld [vmem:[%s5268_s23 + $0x30] sm:$0xff]  ;;  %v1041_v29 = vld [vmem:[%s5268_s23 + $0x28] sm:$0xff] }
 0x11a   : > { %3263 = vmatpush3.msra.mxu0 %v921_v4  ;;  %1086 = vmatpush1.msra.mxu1 %v1048_v22  ;;  %v1040_v30 = vld [vmem:[%s5268_s23 + $0x20] sm:$0xff]  ;;  %v1039_v31 = vld [vmem:[%s5268_s23 + $0x18] sm:$0xff]  ;;  %v1038_v32 = vld [vmem:[%s5268_s23 + $0x10] sm:$0xff] }
 0x11b   : > { %3264 = vmatprep.subr.mxu0 %v4274_v0  ;;  %1087 = vmatprep.subr.mxu1 %v1047_v23  ;;  %v1037_v33 = vld [vmem:[%s5268_s23 + $0x8] sm:$0xff]  ;;  %v1036_v34 = vld [vmem:[%s5268_s23] sm:$0xff]  ;;  %v1489_v23 = vld [vmem:[%s5180_s8 + $0x38] sm:$0xff] }
 0x11c   : > { %3265 = vmatpush3.msra.mxu0 %v920_v5  ;;  %1088 = vmatpush1.msra.mxu1 %v1046_v24  ;;  %v4770_v59 = vld [vmem:[%s916_s25] ss:$0 sm:$0xff]  ;;  %v1488_v24 = vld [vmem:[%s5180_s8 + $0x30] sm:$0xff] }
 0x11d   : > { %3266 = vmatprep.subr.mxu0 %v4274_v0  ;;  %1089 = vmatprep.subr.mxu1 %v1045_v25  ;;  %v1487_v25 = vld [vmem:[%s5180_s8 + $0x28] sm:$0xff] }
 0x11e   : > { %3267 = vmatpush3.msra.mxu0 %v919_v6  ;;  %1090 = vmatpush1.msra.mxu1 %v1044_v26  ;;  %v1486_v26 = vld [vmem:[%s5180_s8 + $0x20] sm:$0xff] }
 0x11f   : > { %3268 = vmatprep.subr.mxu0 %v4274_v0  ;;  %1091 = vmatprep.subr.mxu1 %v1043_v27  ;;  %v1485_v27 = vld [vmem:[%s5180_s8 + $0x18] sm:$0xff] }
 0x120   : > { %3269 = vmatpush3.msra.mxu0 %v918_v7  ;;  %1092 = vmatpush1.msra.mxu1 %v1042_v28  ;;  %v1484_v28 = vld [vmem:[%s5180_s8 + $0x10] sm:$0xff] }
 0x121   : > { %3271 = vmatmul.mubr.msk.f32.vlgmr.msra.gmra.mxu0 %vm926_vm2, %v917_v8  ;;  %3283 = vmatprep.subr.mxu0 %v4274_v0 }
 0x122   : > { %3285 = vmatprep.mubr.msk.f32.mxu0 %vm4275_vm0, %v4274_v0  ;;  %1093 = vmatprep.subr.mxu1 %v1041_v29  ;;  %v1483_v29 = vld [vmem:[%s5180_s8 + $0x8] sm:$0xff] }
 0x123   : > { %1094 = vmatpush1.msra.mxu1 %v1040_v30  ;;  %v1482_v30 = vld [vmem:[%s5180_s8] sm:$0xff] }
 0x124   : > { %1095 = vmatprep.subr.mxu1 %v1039_v31 }
 0x125   : > { %1096 = vmatpush1.msra.mxu1 %v1038_v32 }
 0x126   : > { %1097 = vmatprep.subr.mxu1 %v1037_v33 }
 0x127   : > { %1098 = vmatpush1.msra.mxu1 %v1036_v34 }
 0x128   : > { %3273 = vmatprep.subr.mxu1 %v4274_v0 }
 0x1e1   : > { %v1000_v10 = vpop.f32.mrf.mxu0 }
 0x1e2   : > { %v1001_v11 = vadd.f32 %v1000_v10, %v925_v9 }
 0x1e3   : > { %v3272_v12 = vpop.f32.mrf.mxu0 }
 0x1e4   : > { %v1007_v13 = vsel %vm1006_vm3, %v1001_v11, 0.0 }
 0x1e5   : > { %1008 = vadd.xlane.f32.xlu0 %v1007_v13 }
 0x26e   : > { %v1009_v14 = vpop.xlane.xlu0 %1008 }
 0x26f   : > { %v1011_v15 = vmul.f32 0.015625, %v1009_v14 }
 0x271   : > { %v1012_v16 = vsub.f32 %v1001_v11, %v1011_v15 }
 0x273   : > { %v1013_v17 = vmul.f32 %v1012_v16, %v1012_v16 }
 0x275   : > { %v1014_v18 = vsel %vm1006_vm3, %v1013_v17, 0.0 }
 0x276   : > { %1015 = vadd.xlane.f32.xlu0 %v1014_v18 }
 0x2ff   : > { %v1016_v35 = vpop.xlane.xlu0 %1015 }
 0x300   : > { %v1017_v36 = vmul.f32 0.015625, %v1016_v35 }
 0x302   : > { %v1018_v37 = vadd.f32 1e-12, %v1017_v36 }
 0x304   : > { %3700 = vrsqrt.f32 %v1018_v37  ;;  %v3076_v37 = vld [vmem:[#allocation10] ss:$0 sm:$0xff] }
 0x311   : > { %v3701_v38 = vpop.eup %3700 }
 0x312   : > { %v1020_v40 = vmul.f32 %v3701_v38, %v1012_v16 }
 0x314   : > { %v1027_v42 = vmul.f32 %v3066_v39, %v1020_v40 }
 0x316   : > { %v4738_v43 = vadd.f32 %v3067_v41, %v1027_v42 }
 0x318   : > { %3068 = vmatmul.mubr.msk.f32.vlgmr.msra.gmra.mxu1 %vm1006_vm3, %v4738_v43 }
 0x319   : > { %3275 = vmatprep.mubr.msk.f32.mxu1 %vm4275_vm0, %v4274_v0 }
 0x3d8   : > { %v1133_v49 = vpop.f32.mrf.mxu1 }
 0x3d9   : > { %v1134_v50 = vadd.f32 %v1133_v49, %v1057_v48 }
 0x3da   : > { %v1135_v53 = vpop.f32.mrf.mxu1 }
 0x3db   : > { %1309 = vrot.lane.b32.xlu0 %v1134_v50, %s4276_s3  ;;  %1139 = vrot.lane.b32.xlu1 %v1134_v50, %s4277_s0  ;;  %v1136_v55 = vadd.f32 %v1135_v53, %v1061_v52  ;;  %v1607_v52 = vld [vmem:[#allocation14 + $0x38] sm:$0xff]  ;;  %v1606_v53 = vld [vmem:[#allocation14 + $0x30] sm:$0xff] }
 0x3df   : > { %1311 = vrot.lane.b32.xlu1 %v1134_v50, %s4278_s24 }
 0x44d   : > { %v1140_v54 = vpop.permute.xlu1 %1139  ;;  %v1310_v57 = vpop.permute.xlu0 %1309 }
 0x44e   : > { %3274 = vmatpush3.xpose.msk.msra.mxu1 %vm1141_vm4, %v1140_v54  ;;  %v1605_v54 = vld [vmem:[#allocation14 + $0x28] sm:$0xff] }
 0x44f   : > { %3278 = vmatprep.subr.mxu1 %v4274_v0 }
 0x451   : > { %3276 = vmatmul.mubr.msk.f32.vlgmr.msra.gmra.mxu1 %vm1141_vm4, %v1134_v50  ;;  %v1312_v56 = vpop.permute.xlu1 %1311 }
 0x452   : > { %3279 = vmatpush3.msra.mxu1 %v1136_v55  ;;  %3284 = vmatpush3.xpose.msk.msra.mxu0 %vm1141_vm4, %v1312_v56  ;;  %v1602_v56 = vld [vmem:[#allocation14 + $0x10] sm:$0xff] }
 0x453   : > { %3280 = vmatprep.mubr.msk.f32.mxu1 %vm4275_vm0, %v4274_v0  ;;  %3288 = vmatprep.subr.mxu1 %v4274_v0 }
 0x454   : > { %3293 = vmatprep.subr.mxu0 %v4274_v0 }
 0x455   : > { %3286 = vmatmul.mubr.msk.f32.vlgmr.msra.gmra.mxu0 %vm1141_vm4, %v1310_v57  ;;  %v1601_v57 = vld [vmem:[#allocation14 + $0x8] sm:$0xff] }
 0x456   : > { %3309 = vmatprep.mubr.msk.f32.mxu0 %vm4275_vm0, %v4274_v0  ;;  %3294 = vmatpush3.msra.mxu0 %v1489_v23 }
 0x457   : > { %3295 = vmatprep.subr.mxu0 %v4274_v0 }
 0x458   : > { %3296 = vmatpush3.msra.mxu0 %v1488_v24 }
 0x459   : > { %3297 = vmatprep.subr.mxu0 %v4274_v0 }
 0x45a   : > { %3298 = vmatpush3.msra.mxu0 %v1487_v25 }
 0x45b   : > { %3299 = vmatprep.subr.mxu0 %v4274_v0 }
 0x45c   : > { %3300 = vmatpush3.msra.mxu0 %v1486_v26 }
 0x45d   : > { %3301 = vmatprep.subr.mxu0 %v4274_v0 }
 0x45e   : > { %3302 = vmatpush3.msra.mxu0 %v1485_v27 }
 0x45f   : > { %3303 = vmatprep.subr.mxu0 %v4274_v0 }
 0x460   : > { %3304 = vmatpush3.msra.mxu0 %v1484_v28 }
 0x461   : > { %3305 = vmatprep.subr.mxu0 %v4274_v0 }
 0x462   : > { %3306 = vmatpush3.msra.mxu0 %v1483_v29 }
 0x463   : > { %3307 = vmatprep.subr.mxu0 %v4274_v0 }
 0x464   : > { %3308 = vmatpush3.msra.mxu0 %v1482_v30 }
 0x465   : > { %3331 = vmatprep.subr.mxu0 %v4274_v0 }
 0x511   : > { %v1212_v58 = vpop.f32.mrf.mxu1 }
 0x512   : > { %v1216_v60 = vmul.f32 0.17677669, %v1212_v58  ;;  %v1600_v58 = vld [vmem:[#allocation14] sm:$0xff] }
 0x513   : > { %v3277_v61 = vpop.f32.mrf.mxu1 }
 0x514   : > { %v1223_v62 = vadd.f32 %v4770_v59, %v1216_v60 }
 0x515   : > { %v1383_v63 = vpop.f32.mrf.mxu0 }
 0x516   : > { %v1387_v1 = vmul.f32 0.17677669, %v1383_v63  ;;  %v1225_v2 = vsel %vm1224_vm5, %v1223_v62, -inf }
 0x517   : > { %1226 = vmax.xlane.f32.xlu1 %v1225_v2  ;;  %v3287_v3 = vpop.f32.mrf.mxu0 }
 0x518   : > { %v1388_v4 = vadd.f32 %v4770_v59, %v1387_v1  ;;  %v3078_v1 = vld [vmem:[#allocation11] ss:$0 sm:$0xff]  ;;  %v3079_v3 = vld [vmem:[#allocation13] ss:$0 sm:$0xff] }
 0x51a   : > { %v1389_v5 = vsel %vm1224_vm5, %v1388_v4, -inf }
 0x51b   : > { %1390 = vmax.xlane.f32.xlu0 %v1389_v5 }
 0x5a0   : > { %v1227_v6 = vpop.xlane.xlu1 %1226 }
 0x5a1   : > { %v1228_v7 = vsub.f32 %v1223_v62, %v1227_v6  ;;  %v1712_v6 = vld [vmem:[%s5186_s14 + $0x78] sm:$0xff] }
 0x5a3   : > { %v1229_v8 = vmul.f32 1.442695, %v1228_v7  ;;  %v1711_v7 = vld [vmem:[%s5186_s14 + $0x70] sm:$0xff] }
 0x5a4   : > { %v1391_v9 = vpop.xlane.xlu0 %1390 }
 0x5a5   : > { %3702 = vpow2.f32 %v1229_v8  ;;  %v1392_v10 = vsub.f32 %v1388_v4, %v1391_v9  ;;  %v1710_v8 = vld [vmem:[%s5186_s14 + $0x68] sm:$0xff]  ;;  %v1709_v9 = vld [vmem:[%s5186_s14 + $0x60] sm:$0xff] }
 0x5a7   : > { %v1393_v11 = vmul.f32 1.442695, %v1392_v10  ;;  %v1708_v10 = vld [vmem:[%s5186_s14 + $0x58] sm:$0xff] }
 0x5a9   : > { %3704 = vpow2.f32 %v1393_v11  ;;  %v1707_v11 = vld [vmem:[%s5186_s14 + $0x50] sm:$0xff] }
 0x5b2   : > { %v3703_v12 = vpop.eup %3702 }
 0x5b3   : > { %v1231_v13 = vsel %vm1224_vm5, %v3703_v12, 0.0 }
 0x5b4   : > { %1232 = vadd.xlane.f32.xlu1 %v1231_v13  ;;  %v1705_v13 = vld [vmem:[%s5186_s14 + $0x40] sm:$0xff] }
 0x5b6   : > { %v3705_v14 = vpop.eup %3704 }
 0x5b7   : > { %v1395_v15 = vsel %vm1224_vm5, %v3705_v14, 0.0 }
 0x5b8   : > { %1396 = vadd.xlane.f32.xlu1 %v1395_v15  ;;  %v1703_v15 = vld [vmem:[%s5186_s14 + $0x30] sm:$0xff] }
 0x5c9   : > { %1401 = vrot.lane.b32.xlu1 %v1136_v55, %s4276_s3  ;;  %v1603_v55 = vld [vmem:[#allocation14 + $0x18] sm:$0xff] }
 0x63d   : > { %v1233_v16 = vpop.xlane.xlu1 %1232 }
 0x63e   : > { %3706 = vrcp.f32 %v1233_v16  ;;  %v1702_v16 = vld [vmem:[%s5186_s14 + $0x28] sm:$0xff] }
 0x641   : > { %v1397_v17 = vpop.xlane.xlu1 %1396 }
 0x642   : > { %3708 = vrcp.f32 %v1397_v17  ;;  %v1701_v17 = vld [vmem:[%s5186_s14 + $0x20] sm:$0xff] }
 0x645   : > { %v1402_v20 = vpop.permute.xlu1 %1401 }
 0x64b   : > { %v3707_v18 = vpop.eup %3706 }
 0x64c   : > { %v1235_v19 = vmul.f32 %v3707_v18, %v3703_v12  ;;  %v1706_v12 = vld [vmem:[%s5186_s14 + $0x48] sm:$0xff]  ;;  %v1700_v18 = vld [vmem:[%s5186_s14 + $0x18] sm:$0xff] }
 0x64e   : > { %3281 = vmatmul.mubr.msk.f32.vlgmr.msra.gmra.mxu1 %vm1224_vm5, %v1235_v19  ;;  %v1699_v19 = vld [vmem:[%s5186_s14 + $0x10] sm:$0xff] }
 0x64f   : > { %v3709_v21 = vpop.eup %3708  ;;  %3289 = vmatpush3.msra.mxu1 %v1402_v20  ;;  %3290 = vmatprep.mubr.msk.f32.mxu1 %vm4275_vm0, %v4274_v0  ;;  %v1698_v20 = vld [vmem:[%s5186_s14 + $0x8] sm:$0xff] }
 0x650   : > { %v1399_v22 = vmul.f32 %v3709_v21, %v3705_v14  ;;  %3312 = vmatprep.subr.mxu1 %v4274_v0  ;;  %v1704_v14 = vld [vmem:[%s5186_s14 + $0x38] sm:$0xff]  ;;  %v1697_v21 = vld [vmem:[%s5186_s14] sm:$0xff] }
 0x652   : > { %3291 = vmatmul.mubr.msk.f32.vlgmr.msra.gmra.mxu1 %vm1224_vm5, %v1399_v22  ;;  %v3080_v22 = vld [vmem:[#allocation16] ss:$0 sm:$0xff] }
 0x653   : > { %3328 = vmatprep.mubr.msk.f32.mxu1 %vm4275_vm0, %v4274_v0  ;;  %3313 = vmatpush3.msra.mxu1 %v1607_v52  ;;  %v3098_v52 = vld [vmem:[%s5268_s23 + $0xe8] sm:$0xff] }
 0x654   : > { %3314 = vmatprep.subr.mxu1 %v4274_v0 }
 0x655   : > { %3315 = vmatpush3.msra.mxu1 %v1606_v53  ;;  %v3097_v53 = vld [vmem:[%s5268_s23 + $0xe0] sm:$0xff] }
 0x656   : > { %3316 = vmatprep.subr.mxu1 %v4274_v0 }
 0x657   : > { %3317 = vmatpush3.msra.mxu1 %v1605_v54  ;;  %v3096_v54 = vld [vmem:[%s5268_s23 + $0xd8] sm:$0xff] }
 0x658   : > { %3318 = vmatprep.subr.mxu1 %v4274_v0 }
 0x70e   : > { %v1305_v31 = vpop.f32.mrf.mxu1 }
 0x710   : > { %v3282_v32 = vpop.f32.mrf.mxu1 }
 0x712   : > { %v1473_v33 = vpop.f32.mrf.mxu1 }
 0x713   : > { %1478 = vrot.lane.b32.xlu0 %v1473_v33, %s4278_s24 }
 0x714   : > { %v3292_v34 = vpop.f32.mrf.mxu1 }
 0x785   : > { %v1479_v35 = vpop.permute.xlu0 %1478 }
 0x786   : > { %v1481_v36 = vsel %vm1141_vm4, %v1305_v31, %v1479_v35  ;;  %v3082_v35 = vld [vmem:[#allocation17] ss:$0 sm:$0xff] }
 0x787   : > { %3310 = vmatmul.mubr.msk.f32.vlgmr.msra.gmra.mxu0 %vm1006_vm3, %v1481_v36 }
 0x788   : > { %3363 = vmatprep.mubr.msk.f32.mxu0 %vm4275_vm0, %v4274_v0  ;;  %3332 = vmatpush3.msra.mxu0 %v1712_v6 }
 0x789   : > { %3333 = vmatprep.subr.mxu0 %v4274_v0 }
 0x78a   : > { %3334 = vmatpush3.msra.mxu0 %v1711_v7  ;;  %v3083_v7 = vld [vmem:[#allocation19] ss:$0 sm:$0xff] }
 0x78b   : > { %3335 = vmatprep.subr.mxu0 %v4274_v0 }
 0x78c   : > { %3336 = vmatpush3.msra.mxu0 %v1710_v8 }
 0x78d   : > { %3337 = vmatprep.subr.mxu0 %v4274_v0 }
 0x78e   : > { %3338 = vmatpush3.msra.mxu0 %v1709_v9  ;;  %v3084_v9 = vld [vmem:[#allocation20] ss:$0 sm:$0xff] }
 0x78f   : > { %3339 = vmatprep.subr.mxu0 %v4274_v0 }
 0x790   : > { %3340 = vmatpush3.msra.mxu0 %v1708_v10 }
 0x791   : > { %3341 = vmatprep.subr.mxu0 %v4274_v0 }
 0x792   : > { %3342 = vmatpush3.msra.mxu0 %v1707_v11 }
 0x793   : > { %3343 = vmatprep.subr.mxu0 %v4274_v0 }
 0x794   : > { %3344 = vmatpush3.msra.mxu0 %v1706_v12  ;;  %v1838_v12 = vld [vmem:[#allocation8 + $0x2] sm:$0x3] }
 0x795   : > { %3345 = vmatprep.subr.mxu0 %v4274_v0 }
 0x796   : > { %3346 = vmatpush3.msra.mxu0 %v1705_v13  ;;  %v1843_v13 = vrot.slane %v1838_v12, %v1056_v46 }
 0x797   : > { %3347 = vmatprep.subr.mxu0 %v4274_v0 }
 0x798   : > { %3348 = vmatpush3.msra.mxu0 %v1704_v14 }
 0x799   : > { %3349 = vmatprep.subr.mxu0 %v4274_v0 }
 0x79a   : > { %3350 = vmatpush3.msra.mxu0 %v1703_v15 }
 0x79b   : > { %3351 = vmatprep.subr.mxu0 %v4274_v0 }
 0x79c   : > { %3352 = vmatpush3.msra.mxu0 %v1702_v16  ;;  %v1847_v16 = vrot.slane %v1838_v12, %v1060_v51  ;;  %v2390_v12 = vld [vmem:[#allocation14 + $0x78] sm:$0xff] }
 0x79d   : > { %3353 = vmatprep.subr.mxu0 %v4274_v0 }
 0x79e   : > { %3354 = vmatpush3.msra.mxu0 %v1701_v17 }
 0x79f   : > { %3355 = vmatprep.subr.mxu0 %v4274_v0 }
 0x7a0   : > { %3356 = vmatpush3.msra.mxu0 %v1700_v18 }
 0x7a1   : > { %3357 = vmatprep.subr.mxu0 %v4274_v0 }
 0x7a2   : > { %3358 = vmatpush3.msra.mxu0 %v1699_v19 }
 0x7a3   : > { %3359 = vmatprep.subr.mxu0 %v4274_v0 }
 0x7a4   : > { %3360 = vmatpush3.msra.mxu0 %v1698_v20 }
 0x7a5   : > { %3361 = vmatprep.subr.mxu0 %v4274_v0 }
 0x7a6   : > { %3362 = vmatpush3.msra.mxu0 %v1697_v21 }
 0x7a7   : > { %3386 = vmatprep.subr.mxu0 %v4274_v0 }
 0x847   : > { %v1566_v38 = vpop.f32.mrf.mxu0 }
 0x848   : > { %v1567_v39 = vadd.f32 %v3076_v37, %v1566_v38 }
 0x849   : > { %v3311_v40 = vpop.f32.mrf.mxu0 }
 0x84a   : > { %v1570_v41 = vadd.f32 %v1567_v39, %v4738_v43  ;;  %v1604_v43 = vld [vmem:[#allocation14 + $0x20] sm:$0xff] }
 0x84b   : > { %3319 = vmatpush3.msra.mxu1 %v1604_v43  ;;  %v3095_v43 = vld [vmem:[%s5268_s23 + $0xd0] sm:$0xff] }
 0x84c   : > { %v1573_v42 = vsel %vm1006_vm3, %v1570_v41, 0.0  ;;  %3320 = vmatprep.subr.mxu1 %v4274_v0 }
 0x84d   : > { %1574 = vadd.xlane.f32.xlu1 %v1573_v42  ;;  %3321 = vmatpush3.msra.mxu1 %v1603_v55  ;;  %v3094_v55 = vld [vmem:[%s5268_s23 + $0xc8] sm:$0xff] }
 0x84e   : > { %3322 = vmatprep.subr.mxu1 %v4274_v0 }
 0x84f   : > { %3323 = vmatpush3.msra.mxu1 %v1602_v56  ;;  %v3093_v56 = vld [vmem:[%s5268_s23 + $0xc0] sm:$0xff] }
 0x850   : > { %3324 = vmatprep.subr.mxu1 %v4274_v0 }
 0x851   : > { %3325 = vmatpush3.msra.mxu1 %v1601_v57  ;;  %v3092_v57 = vld [vmem:[%s5268_s23 + $0xb8] sm:$0xff] }
 0x852   : > { %3326 = vmatprep.subr.mxu1 %v4274_v0 }
 0x853   : > { %3327 = vmatpush3.msra.mxu1 %v1600_v58  ;;  %v3091_v58 = vld [vmem:[%s5268_s23 + $0xb0] sm:$0xff] }
 0x8d6   : > { %v1575_v44 = vpop.xlane.xlu1 %1574 }
 0x8d7   : > { %v1576_v47 = vmul.f32 0.015625, %v1575_v44 }
 0x8d9   : > { %v1577_v48 = vsub.f32 %v1570_v41, %v1576_v47 }
 0x8db   : > { %v1578_v49 = vmul.f32 %v1577_v48, %v1577_v48 }
 0x8dd   : > { %v1579_v50 = vsel %vm1006_vm3, %v1578_v49, 0.0  ;;  %v3100_v49 = vld [vmem:[%s5268_s23 + $0xf8] sm:$0xff] }
 0x8de   : > { %1580 = vadd.xlane.f32.xlu0 %v1579_v50  ;;  %1869 = vmatprep.subr.mxu1 %v3100_v49  ;;  %v3099_v50 = vld [vmem:[%s5268_s23 + $0xf0] sm:$0xff] }
 0x967   : > { %v1581_v60 = vpop.xlane.xlu0 %1580 }
 0x968   : > { %v1582_v61 = vmul.f32 0.015625, %v1581_v60  ;;  %v3090_v60 = vld [vmem:[%s5268_s23 + $0xa8] sm:$0xff] }
 0x96a   : > { %v1583_v62 = vadd.f32 1e-12, %v1582_v61  ;;  %v3089_v61 = vld [vmem:[%s5268_s23 + $0xa0] sm:$0xff] }
 0x96c   : > { %3710 = vrsqrt.f32 %v1583_v62  ;;  %v3088_v62 = vld [vmem:[%s5268_s23 + $0x98] sm:$0xff] }
 0x979   : > { %v3711_v63 = vpop.eup %3710 }
 0x97a   : > { %v1585_v2 = vmul.f32 %v3711_v63, %v1577_v48  ;;  %v3087_v63 = vld [vmem:[%s5268_s23 + $0x90] sm:$0xff] }
 0x97c   : > { %v1592_v4 = vmul.f32 %v3078_v1, %v1585_v2  ;;  %v3086_v1 = vld [vmem:[%s5268_s23 + $0x88] sm:$0xff]  ;;  %v3085_v2 = vld [vmem:[%s5268_s23 + $0x80] sm:$0xff] }
 0x97e   : > { %v4833_v5 = vadd.f32 %v3079_v3, %v1592_v4 }
 0x980   : > { %3329 = vmatmul.mubr.msk.f32.vlgmr.msra.gmra.mxu1 %vm1006_vm3, %v4833_v5 }
 0x981   : > { %1917 = vmatprep.mubr.f32.mxu1 %v4274_v0  ;;  %1870 = vmatpush1.msra.mxu1 %v3099_v50  ;;  %v3115_v50 = vld [vmem:[%s5180_s8 + $0x78] sm:$0xff] }
 0x982   : > { %1871 = vmatprep.subr.mxu1 %v3098_v52  ;;  %v3114_v52 = vld [vmem:[%s5180_s8 + $0x70] sm:$0xff] }
 0x983   : > { %1872 = vmatpush1.msra.mxu1 %v3097_v53  ;;  %v3113_v53 = vld [vmem:[%s5180_s8 + $0x68] sm:$0xff] }
 0x984   : > { %1873 = vmatprep.subr.mxu1 %v3096_v54  ;;  %v3112_v54 = vld [vmem:[%s5180_s8 + $0x60] sm:$0xff] }
 0x985   : > { %1874 = vmatpush1.msra.mxu1 %v3095_v43  ;;  %v3111_v43 = vld [vmem:[%s5180_s8 + $0x58] sm:$0xff] }
 0x986   : > { %1875 = vmatprep.subr.mxu1 %v3094_v55  ;;  %v3110_v55 = vld [vmem:[%s5180_s8 + $0x50] sm:$0xff] }
 0x987   : > { %1876 = vmatpush1.msra.mxu1 %v3093_v56  ;;  %v3109_v56 = vld [vmem:[%s5180_s8 + $0x48] sm:$0xff] }
 0x988   : > { %1877 = vmatprep.subr.mxu1 %v3092_v57  ;;  %v3108_v57 = vld [vmem:[%s5180_s8 + $0x40] sm:$0xff] }
 0x989   : > { %1878 = vmatpush1.msra.mxu1 %v3091_v58 }
 0x98a   : > { %1879 = vmatprep.subr.mxu1 %v3090_v60 }
 0x98b   : > { %1880 = vmatpush1.msra.mxu1 %v3089_v61 }
 0x98c   : > { %1881 = vmatprep.subr.mxu1 %v3088_v62 }
 0x98d   : > { %1882 = vmatpush1.msra.mxu1 %v3087_v63  ;;  %v3116_v63 = vld [vmem:[#allocation10 + $0x1] ss:$0 sm:$0xff] }
 0x98e   : > { %1883 = vmatprep.subr.mxu1 %v3086_v1 }
 0x98f   : > { %1884 = vmatpush1.msra.mxu1 %v3085_v2 }
 0x990   : > { %3366 = vmatprep.subr.mxu1 %v4274_v0 }
 0xa40   : > { %v1684_v23 = vpop.f32.mrf.mxu1 }
 0xa41   : > { %v1685_v24 = vadd.f32 %v3080_v22, %v1684_v23 }
 0xa42   : > { %v3330_v25 = vpop.f32.mrf.mxu1 }
 0xa43   : > { %v1689_v26 = vmul.f32 0.044715, %v1685_v24  ;;  %v1688_v32 = vmul.f32 0.5, %v1685_v24 }
 0xa45   : > { %v1690_v27 = vmul.f32 %v1689_v26, %v1685_v24 }
 0xa47   : > { %v1691_v28 = vmul.f32 %v1690_v27, %v1685_v24 }
 0xa49   : > { %v1692_v29 = vadd.f32 %v1691_v28, %v1685_v24 }
 0xa4b   : > { %v1693_v30 = vmul.f32 0.7978846, %v1692_v29 }
 0xa4d   : > { %3712 = vtanh.f32 %v1693_v30 }
 0xa5a   : > { %v3713_v31 = vpop.eup %3712 }
 0xa5b   : > { %v1695_v33 = vadd.f32 1.0, %v3713_v31 }
 0xa5d   : > { %v1696_v34 = vmul.f32 %v1695_v33, %v1688_v32 }
 0xa5f   : > { %3364 = vmatmul.mubr.f32.vlgmr.msra.gmra.mxu0 %v1696_v34 }
 0xa60   : > { %3402 = vmatprep.mubr.msk.f32.mxu0 %vm4275_vm0, %v4274_v0  ;;  %3387 = vmatpush3.msra.mxu0 %v3115_v50 }
 0xa61   : > { %3388 = vmatprep.subr.mxu0 %v4274_v0 }
 0xa62   : > { %3389 = vmatpush3.msra.mxu0 %v3114_v52 }
 0xa63   : > { %3390 = vmatprep.subr.mxu0 %v4274_v0 }
 0xa64   : > { %3391 = vmatpush3.msra.mxu0 %v3113_v53 }
 0xa65   : > { %3392 = vmatprep.subr.mxu0 %v4274_v0 }
 0xa66   : > { %3393 = vmatpush3.msra.mxu0 %v3112_v54 }
 0xa67   : > { %3394 = vmatprep.subr.mxu0 %v4274_v0 }
 0xa68   : > { %3395 = vmatpush3.msra.mxu0 %v3111_v43 }
 0xa69   : > { %3396 = vmatprep.subr.mxu0 %v4274_v0 }
 0xa6a   : > { %3397 = vmatpush3.msra.mxu0 %v3110_v55 }
 0xa6b   : > { %3398 = vmatprep.subr.mxu0 %v4274_v0 }
 0xa6c   : > { %3399 = vmatpush3.msra.mxu0 %v3109_v56  ;;  %v3138_v56 = vld [vmem:[#allocation17 + $0x1] ss:$0 sm:$0xff] }
 0xa6d   : > { %3400 = vmatprep.subr.mxu0 %v4274_v0 }
 0xa6e   : > { %3401 = vmatpush3.msra.mxu0 %v3108_v57 }
 0xa6f   : > { %3424 = vmatprep.subr.mxu0 %v4274_v0 }
 0xb1f   : > { %v1786_v36 = vpop.f32.mrf.mxu0 }
 0xb20   : > { %v1787_v37 = vadd.f32 %v3082_v35, %v1786_v36 }
 0xb21   : > { %v3365_v38 = vpop.f32.mrf.mxu0 }
 0xb22   : > { %v1790_v39 = vadd.f32 %v1787_v37, %v4833_v5 }
 0xb24   : > { %v1793_v40 = vsel %vm1006_vm3, %v1790_v39, 0.0 }
 0xb25   : > { %1794 = vadd.xlane.f32.xlu1 %v1793_v40 }
 0xbae   : > { %v1795_v41 = vpop.xlane.xlu1 %1794 }
 0xbaf   : > { %v1796_v42 = vmul.f32 0.015625, %v1795_v41 }
 0xbb1   : > { %v1797_v44 = vsub.f32 %v1790_v39, %v1796_v42 }
 0xbb3   : > { %v1798_v47 = vmul.f32 %v1797_v44, %v1797_v44 }
 0xbb5   : > { %v1799_v48 = vsel %vm1006_vm3, %v1798_v47, 0.0 }
 0xbb6   : > { %1800 = vadd.xlane.f32.xlu1 %v1799_v48 }
 0xc3f   : > { %v1801_v3 = vpop.xlane.xlu1 %1800 }
 0xc40   : > { %v1802_v4 = vmul.f32 0.015625, %v1801_v3 }
 0xc42   : > { %v1803_v5 = vadd.f32 1e-12, %v1802_v4 }
 0xc44   : > { %3714 = vrsqrt.f32 %v1803_v5 }
 0xc51   : > { %v3715_v6 = vpop.eup %3714 }
 0xc52   : > { %v1805_v8 = vmul.f32 %v3715_v6, %v1797_v44 }
 0xc54   : > { %v1812_v10 = vmul.f32 %v3083_v7, %v1805_v8 }
 0xc56   : > { %v4956_v11 = vadd.f32 %v3084_v9, %v1812_v10 }
 0xc58   : > { %3101 = vmatmul.mubr.msk.f32.vlgmr.msra.gmra.mxu1 %vm1006_vm3, %v4956_v11 }
 0xc59   : > { %3368 = vmatprep.mubr.msk.f32.mxu1 %vm4275_vm0, %v4274_v0 }
 0xd18   : > { %v1919_v14 = vpop.f32.mrf.mxu1 }
 0xd19   : > { %v1920_v15 = vadd.f32 %v1919_v14, %v1843_v13  ;;  %v2389_v13 = vld [vmem:[#allocation14 + $0x70] sm:$0xff]  ;;  %v2388_v14 = vld [vmem:[#allocation14 + $0x68] sm:$0xff] }
 0xd1a   : > { %v1921_v17 = vpop.f32.mrf.mxu1 }
 0xd1b   : > { %1925 = vrot.lane.b32.xlu1 %v1920_v15, %s4277_s0  ;;  %v1922_v19 = vadd.f32 %v1921_v17, %v1847_v16  ;;  %v2385_v16 = vld [vmem:[#allocation14 + $0x50] sm:$0xff]  ;;  %v2384_v17 = vld [vmem:[#allocation14 + $0x48] sm:$0xff] }
 0xd1f   : > { %2087 = vrot.lane.b32.xlu1 %v1920_v15, %s4276_s3 }
 0xd8d   : > { %v1926_v18 = vpop.permute.xlu1 %1925 }
 0xd8e   : > { %3367 = vmatpush3.xpose.msk.msra.mxu1 %vm1141_vm4, %v1926_v18  ;;  %v2383_v18 = vld [vmem:[#allocation14 + $0x40] sm:$0xff] }
 0xd8f   : > { %3371 = vmatprep.subr.mxu1 %v4274_v0 }
 0xd91   : > { %3369 = vmatmul.mubr.msk.f32.vlgmr.msra.gmra.mxu1 %vm1141_vm4, %v1920_v15  ;;  %v2088_v31 = vpop.permute.xlu1 %2087 }
 0xd92   : > { %3372 = vmatpush3.msra.mxu1 %v1922_v19  ;;  %3373 = vmatprep.mubr.msk.f32.mxu1 %vm4275_vm0, %v4274_v0 }
 0xd93   : > { %3376 = vmatprep.subr.mxu1 %v4274_v0 }
 0xe51   : > { %v1997_v46 = vpop.f32.mrf.mxu1 }
 0xe52   : > { %v2001_v20 = vmul.f32 0.17677669, %v1997_v46 }
 0xe53   : > { %v3370_v21 = vpop.f32.mrf.mxu1 }
 0xe54   : > { %v2002_v45 = vadd.f32 %v4770_v59, %v2001_v20 }
 0xe56   : > { %v2003_v51 = vsel %vm1224_vm5, %v2002_v45, -inf }
 0xe57   : > { %2004 = vmax.xlane.f32.xlu0 %v2003_v51 }
 0xee0   : > { %v2005_v22 = vpop.xlane.xlu0 %2004 }
 0xee1   : > { %v2006_v23 = vsub.f32 %v2002_v45, %v2005_v22  ;;  %v3118_v45 = vld [vmem:[#allocation11 + $0x1] ss:$0 sm:$0xff]  ;;  %v3119_v22 = vld [vmem:[#allocation13 + $0x1] ss:$0 sm:$0xff] }
 0xee3   : > { %v2007_v24 = vmul.f32 1.442695, %v2006_v23 }
 0xee5   : > { %3716 = vpow2.f32 %v2007_v24 }
 0xef2   : > { %v3717_v25 = vpop.eup %3716 }
 0xef3   : > { %v2009_v26 = vsel %vm1224_vm5, %v3717_v25, 0.0 }
 0xef4   : > { %2010 = vadd.xlane.f32.xlu0 %v2009_v26  ;;  %v3136_v26 = vld [vmem:[%s5186_s14 + $0xf0] sm:$0xff] }
 0xf0a   : > { %2089 = vrot.lane.b32.xlu0 %v1920_v15, %s4278_s24  ;;  %v2386_v15 = vld [vmem:[#allocation14 + $0x58] sm:$0xff] }
 0xf7d   : > { %v2011_v27 = vpop.xlane.xlu0 %2010 }
 0xf7e   : > { %3718 = vrcp.f32 %v2011_v27  ;;  %v3135_v27 = vld [vmem:[%s5186_s14 + $0xe8] sm:$0xff] }
 0xf81   : > { %v2090_v30 = vpop.permute.xlu0 %2089 }
 0xf8b   : > { %v3719_v28 = vpop.eup %3718 }
 0xf8c   : > { %v2013_v29 = vmul.f32 %v3719_v28, %v3717_v25  ;;  %v3137_v25 = vld [vmem:[%s5186_s14 + $0xf8] sm:$0xff]  ;;  %v3134_v28 = vld [vmem:[%s5186_s14 + $0xe0] sm:$0xff] }
 0xf8e   : > { %3374 = vmatmul.mubr.msk.f32.vlgmr.msra.gmra.mxu1 %vm1224_vm5, %v2013_v29  ;;  %v3133_v29 = vld [vmem:[%s5186_s14 + $0xd8] sm:$0xff] }
 0xf8f   : > { %3377 = vmatpush3.xpose.msk.msra.mxu1 %vm1141_vm4, %v2090_v30  ;;  %3378 = vmatprep.mubr.msk.f32.mxu1 %vm4275_vm0, %v4274_v0  ;;  %v3132_v30 = vld [vmem:[%s5186_s14 + $0xd0] sm:$0xff] }
 0xf90   : > { %3381 = vmatprep.subr.mxu1 %v4274_v0 }
 0xf92   : > { %3379 = vmatmul.mubr.msk.f32.vlgmr.msra.gmra.mxu1 %vm1141_vm4, %v2088_v31  ;;  %v3131_v31 = vld [vmem:[%s5186_s14 + $0xc8] sm:$0xff] }
 0xf93   : > { %3383 = vmatprep.mubr.msk.f32.mxu1 %vm4275_vm0, %v4274_v0 }
0x104e   : > { %v2083_v32 = vpop.f32.mrf.mxu1 }
0x1050   : > { %v3375_v33 = vpop.f32.mrf.mxu1 }
0x1051   : > { %v3129_v33 = vld [vmem:[%s5186_s14 + $0xb8] sm:$0xff] }
0x1052   : > { %v2161_v34 = vpop.f32.mrf.mxu1 }
0x1053   : > { %v2165_v35 = vmul.f32 0.17677669, %v2161_v34  ;;  %v3128_v34 = vld [vmem:[%s5186_s14 + $0xb0] sm:$0xff] }
0x1054   : > { %v3380_v36 = vpop.f32.mrf.mxu1 }
0x1055   : > { %v2166_v37 = vadd.f32 %v4770_v59, %v2165_v35  ;;  %v3127_v35 = vld [vmem:[%s5186_s14 + $0xa8] sm:$0xff]  ;;  %v3126_v36 = vld [vmem:[%s5186_s14 + $0xa0] sm:$0xff] }
0x1057   : > { %v2167_v38 = vsel %vm1224_vm5, %v2166_v37, -inf }
0x1058   : > { %2168 = vmax.xlane.f32.xlu1 %v2167_v38  ;;  %v3124_v38 = vld [vmem:[%s5186_s14 + $0x90] sm:$0xff] }
0x1069   : > { %2179 = vrot.lane.b32.xlu1 %v1922_v19, %s4276_s3 }
0x10e1   : > { %v2169_v39 = vpop.xlane.xlu1 %2168 }
0x10e2   : > { %v2170_v40 = vsub.f32 %v2166_v37, %v2169_v39  ;;  %v3125_v37 = vld [vmem:[%s5186_s14 + $0x98] sm:$0xff]  ;;  %v3123_v39 = vld [vmem:[%s5186_s14 + $0x88] sm:$0xff] }
0x10e4   : > { %v2171_v41 = vmul.f32 1.442695, %v2170_v40  ;;  %v3122_v40 = vld [vmem:[%s5186_s14 + $0x80] sm:$0xff] }
0x10e5   : > { %v2180_v42 = vpop.permute.xlu1 %2179 }
0x10e6   : > { %3720 = vpow2.f32 %v2171_v41  ;;  %3382 = vmatpush3.msra.mxu1 %v2180_v42  ;;  %v3120_v41 = vld [vmem:[#allocation16 + $0x1] ss:$0 sm:$0xff] }
0x10e7   : > { %3405 = vmatprep.subr.mxu1 %v4274_v0 }
0x10f3   : > { %v3721_v44 = vpop.eup %3720 }
0x10f4   : > { %v2173_v47 = vsel %vm1224_vm5, %v3721_v44, 0.0 }
0x10f5   : > { %2174 = vadd.xlane.f32.xlu0 %v2173_v47 }
0x117e   : > { %v2175_v48 = vpop.xlane.xlu0 %2174 }
0x117f   : > { %3722 = vrcp.f32 %v2175_v48 }
0x118c   : > { %v3723_v59 = vpop.eup %3722 }
0x118d   : > { %v2177_v49 = vmul.f32 %v3723_v59, %v3721_v44 }
0x118f   : > { %3384 = vmatmul.mubr.msk.f32.vlgmr.msra.gmra.mxu1 %vm1224_vm5, %v2177_v49 }
0x1190   : > { %3421 = vmatprep.mubr.msk.f32.mxu1 %vm4275_vm0, %v4274_v0  ;;  %3406 = vmatpush3.msra.mxu1 %v2390_v12  ;;  %v2609_v12 = vld [vmem:[#allocation22 + $0x8] sm:$0xff] }
0x1191   : > { %3407 = vmatprep.subr.mxu1 %v4274_v0 }
0x1192   : > { %3408 = vmatpush3.msra.mxu1 %v2389_v13  ;;  %v2608_v13 = vld [vmem:[#allocation22] sm:$0xff] }
0x1193   : > { %3409 = vmatprep.subr.mxu1 %v4274_v0 }
0x1194   : > { %3410 = vmatpush3.msra.mxu1 %v2388_v14 }
0x1195   : > { %3411 = vmatprep.subr.mxu1 %v4274_v0 }
0x124f   : > { %v2251_v58 = vpop.f32.mrf.mxu1 }
0x1250   : > { %2256 = vrot.lane.b32.xlu0 %v2251_v58, %s4278_s24 }
0x1251   : > { %v3385_v60 = vpop.f32.mrf.mxu1 }
0x12c2   : > { %v2257_v61 = vpop.permute.xlu0 %2256 }
0x12c3   : > { %v2259_v62 = vsel %vm1141_vm4, %v2083_v32, %v2257_v61  ;;  %v3130_v32 = vld [vmem:[%s5186_s14 + $0xc0] sm:$0xff] }
0x12c4   : > { %3403 = vmatmul.mubr.msk.f32.vlgmr.msra.gmra.mxu0 %vm1006_vm3, %v2259_v62 }
0x12c5   : > { %3456 = vmatprep.mubr.msk.f32.mxu0 %vm4275_vm0, %v4274_v0  ;;  %3425 = vmatpush3.msra.mxu0 %v3137_v25 }
0x12c6   : > { %3426 = vmatprep.subr.mxu0 %v4274_v0 }
0x12c7   : > { %3427 = vmatpush3.msra.mxu0 %v3136_v26 }
0x12c8   : > { %3428 = vmatprep.subr.mxu0 %v4274_v0 }
0x12c9   : > { %3429 = vmatpush3.msra.mxu0 %v3135_v27 }
0x12ca   : > { %3430 = vmatprep.subr.mxu0 %v4274_v0 }
0x12cb   : > { %3431 = vmatpush3.msra.mxu0 %v3134_v28 }
0x12cc   : > { %3432 = vmatprep.subr.mxu0 %v4274_v0 }
0x12cd   : > { %3433 = vmatpush3.msra.mxu0 %v3133_v29 }
0x12ce   : > { %3434 = vmatprep.subr.mxu0 %v4274_v0 }
0x12cf   : > { %3435 = vmatpush3.msra.mxu0 %v3132_v30  ;;  %v2717_v30 = vld [vmem:[#allocation25 + $0x18] sm:$0xff] }
0x12d0   : > { %3436 = vmatprep.subr.mxu0 %v4274_v0 }
0x12d1   : > { %3437 = vmatpush3.msra.mxu0 %v3131_v31  ;;  %v2716_v31 = vld [vmem:[#allocation25 + $0x10] sm:$0xff] }
0x12d2   : > { %3438 = vmatprep.subr.mxu0 %v4274_v0 }
0x12d3   : > { %3439 = vmatpush3.msra.mxu0 %v3130_v32  ;;  %v2715_v32 = vld [vmem:[#allocation25 + $0x8] sm:$0xff] }
0x12d4   : > { %3440 = vmatprep.subr.mxu0 %v4274_v0 }
0x12d5   : > { %3441 = vmatpush3.msra.mxu0 %v3129_v33  ;;  %v2714_v33 = vld [vmem:[#allocation25] sm:$0xff] }
0x12d6   : > { %3442 = vmatprep.subr.mxu0 %v4274_v0 }
0x12d7   : > { %3443 = vmatpush3.msra.mxu0 %v3128_v34 }
0x12d8   : > { %3444 = vmatprep.subr.mxu0 %v4274_v0 }
0x12d9   : > { %3445 = vmatpush3.msra.mxu0 %v3127_v35 }
0x12da   : > { %3446 = vmatprep.subr.mxu0 %v4274_v0 }
0x12db   : > { %3447 = vmatpush3.msra.mxu0 %v3126_v36 }
0x12dc   : > { %3448 = vmatprep.subr.mxu0 %v4274_v0 }
0x12dd   : > { %3449 = vmatpush3.msra.mxu0 %v3125_v37 }
0x12de   : > { %3450 = vmatprep.subr.mxu0 %v4274_v0 }
0x12df   : > { %3451 = vmatpush3.msra.mxu0 %v3124_v38  ;;  %v2718_v38 = vld [vmem:[#allocation26] sm:$0x1] }
0x12e0   : > { %3452 = vmatprep.subr.mxu0 %v4274_v0 }
0x12e1   : > { %3453 = vmatpush3.msra.mxu0 %v3123_v39 }
0x12e2   : > { %3454 = vmatprep.subr.mxu0 %v4274_v0 }
0x12e3   : > { %3455 = vmatpush3.msra.mxu0 %v3122_v40 }
0x1384   : > { %v2346_v1 = vpop.f32.mrf.mxu0 }
0x1385   : > { %v2347_v2 = vadd.f32 %v3116_v63, %v2346_v1 }
0x1386   : > { %v3404_v3 = vpop.f32.mrf.mxu0 }
0x1387   : > { %v2350_v4 = vadd.f32 %v2347_v2, %v4956_v11  ;;  %v2387_v11 = vld [vmem:[#allocation14 + $0x60] sm:$0xff] }
0x1388   : > { %3412 = vmatpush3.msra.mxu1 %v2387_v11 }
0x1389   : > { %v2355_v5 = vsel %vm1006_vm3, %v2350_v4, 0.0  ;;  %3413 = vmatprep.subr.mxu1 %v4274_v0 }
0x138a   : > { %2356 = vadd.xlane.f32.xlu1 %v2355_v5  ;;  %3414 = vmatpush3.msra.mxu1 %v2386_v15  ;;  %v2615_v5 = vld [vmem:[#allocation22 + $0x38] sm:$0xff] }
0x138b   : > { %3415 = vmatprep.subr.mxu1 %v4274_v0 }
0x138c   : > { %3416 = vmatpush3.msra.mxu1 %v2385_v16 }
0x138d   : > { %3417 = vmatprep.subr.mxu1 %v4274_v0 }
0x138e   : > { %3418 = vmatpush3.msra.mxu1 %v2384_v17  ;;  %v3139_v17 = vld [vmem:[#allocation19 + $0x1] ss:$0 sm:$0xff] }
0x138f   : > { %3419 = vmatprep.subr.mxu1 %v4274_v0 }
0x1390   : > { %3420 = vmatpush3.msra.mxu1 %v2383_v18 }
0x1391   : > { %3459 = vmatprep.subr.mxu1 %v4274_v0 }
0x1413   : > { %v2357_v6 = vpop.xlane.xlu1 %2356 }
0x1414   : > { %v2358_v7 = vmul.f32 0.015625, %v2357_v6  ;;  %v2614_v6 = vld [vmem:[#allocation22 + $0x30] sm:$0xff] }
0x1416   : > { %v2359_v8 = vsub.f32 %v2350_v4, %v2358_v7  ;;  %v2613_v7 = vld [vmem:[#allocation22 + $0x28] sm:$0xff] }
0x1418   : > { %v2360_v9 = vmul.f32 %v2359_v8, %v2359_v8 }
0x141a   : > { %v2361_v10 = vsel %vm1006_vm3, %v2360_v9, 0.0  ;;  %v2611_v9 = vld [vmem:[#allocation22 + $0x18] sm:$0xff] }
0x141b   : > { %2362 = vadd.xlane.f32.xlu0 %v2361_v10  ;;  %v2610_v10 = vld [vmem:[#allocation22 + $0x10] sm:$0xff] }
0x14a4   : > { %v2363_v19 = vpop.xlane.xlu0 %2362 }
0x14a5   : > { %v2364_v46 = vmul.f32 0.015625, %v2363_v19  ;;  %v3140_v19 = vld [vmem:[#allocation20 + $0x1] ss:$0 sm:$0xff] }
0x14a7   : > { %v2365_v20 = vadd.f32 1e-12, %v2364_v46 }
0x14a9   : > { %3724 = vrsqrt.f32 %v2365_v20 }
0x14b6   : > { %v3725_v21 = vpop.eup %3724 }
0x14b7   : > { %v2367_v51 = vmul.f32 %v3725_v21, %v2359_v8  ;;  %v2612_v8 = vld [vmem:[#allocation22 + $0x20] sm:$0xff] }
0x14b8   : > { %v3141_v21 = vld [vmem:[#allocation23] ss:$0 sm:$0xff] }
0x14b9   : > { %v2374_v23 = vmul.f32 %v3118_v45, %v2367_v51 }
0x14bb   : > { %v5042_v24 = vadd.f32 %v3119_v22, %v2374_v23 }
0x14bd   : > { %3422 = vmatmul.mubr.msk.f32.vlgmr.msra.gmra.mxu1 %vm1006_vm3, %v5042_v24 }
0x14be   : > { %3475 = vmatprep.mubr.msk.f32.mxu1 %vm4275_vm0, %v4274_v0  ;;  %3460 = vmatpush3.msra.mxu1 %v2615_v5 }
0x14bf   : > { %3461 = vmatprep.subr.mxu1 %v4274_v0 }
0x14c0   : > { %3462 = vmatpush3.msra.mxu1 %v2614_v6 }
0x14c1   : > { %3463 = vmatprep.subr.mxu1 %v4274_v0 }
0x14c2   : > { %3464 = vmatpush3.msra.mxu1 %v2613_v7 }
0x14c3   : > { %3465 = vmatprep.subr.mxu1 %v4274_v0 }
0x14c4   : > { %3466 = vmatpush3.msra.mxu1 %v2612_v8 }
0x14c5   : > { %3467 = vmatprep.subr.mxu1 %v4274_v0 }
0x14c6   : > { %3468 = vmatpush3.msra.mxu1 %v2611_v9 }
0x14c7   : > { %3469 = vmatprep.subr.mxu1 %v4274_v0 }
0x14c8   : > { %3470 = vmatpush3.msra.mxu1 %v2610_v10 }
0x14c9   : > { %3471 = vmatprep.subr.mxu1 %v4274_v0 }
0x14ca   : > { %3472 = vmatpush3.msra.mxu1 %v2609_v12 }
0x14cb   : > { %3473 = vmatprep.subr.mxu1 %v4274_v0 }
0x14cc   : > { %3474 = vmatpush3.msra.mxu1 %v2608_v13 }
0x14cd   : > { %3478 = vmatprep.subr.mxu1 %v4274_v0 }
0x157d   : > { %v2468_v42 = vpop.f32.mrf.mxu1 }
0x157e   : > { %v2469_v44 = vadd.f32 %v3120_v41, %v2468_v42 }
0x157f   : > { %v3423_v47 = vpop.f32.mrf.mxu1 }
0x1580   : > { %v2473_v48 = vmul.f32 0.044715, %v2469_v44  ;;  %v2472_v54 = vmul.f32 0.5, %v2469_v44 }
0x1582   : > { %v2474_v59 = vmul.f32 %v2473_v48, %v2469_v44 }
0x1584   : > { %v2475_v49 = vmul.f32 %v2474_v59, %v2469_v44 }
0x1586   : > { %v2476_v50 = vadd.f32 %v2475_v49, %v2469_v44 }
0x1588   : > { %v2477_v52 = vmul.f32 0.7978846, %v2476_v50 }
0x158a   : > { %3726 = vtanh.f32 %v2477_v52 }
0x1597   : > { %v3727_v53 = vpop.eup %3726 }
0x1598   : > { %v2479_v43 = vadd.f32 1.0, %v3727_v53 }
0x159a   : > { %v2480_v55 = vmul.f32 %v2479_v43, %v2472_v54 }
0x159c   : > { %3457 = vmatmul.mubr.f32.vlgmr.msra.gmra.mxu0 %v2480_v55 }
0x165c   : > { %v2572_v57 = vpop.f32.mrf.mxu0 }
0x165d   : > { %v2573_v58 = vadd.f32 %v3138_v56, %v2572_v57 }
0x165e   : > { %v3458_v60 = vpop.f32.mrf.mxu0 }
0x165f   : > { %v2576_v61 = vadd.f32 %v2573_v58, %v5042_v24 }
0x1661   : > { %v2581_v62 = vsel %vm1006_vm3, %v2576_v61, 0.0 }
0x1662   : > { %2582 = vadd.xlane.f32.xlu1 %v2581_v62 }
0x16eb   : > { %v2583_v63 = vpop.xlane.xlu1 %2582 }
0x16ec   : > { %v2584_v1 = vmul.f32 0.015625, %v2583_v63 }
0x16ee   : > { %v2585_v2 = vsub.f32 %v2576_v61, %v2584_v1 }
0x16f0   : > { %v2586_v3 = vmul.f32 %v2585_v2, %v2585_v2 }
0x16f2   : > { %v2587_v4 = vsel %vm1006_vm3, %v2586_v3, 0.0 }
0x16f3   : > { %2588 = vadd.xlane.f32.xlu1 %v2587_v4 }
0x177c   : > { %v2589_v14 = vpop.xlane.xlu1 %2588 }
0x177d   : > { %v2590_v11 = vmul.f32 0.015625, %v2589_v14 }
0x177f   : > { %v2591_v15 = vadd.f32 1e-12, %v2590_v11 }
0x1781   : > { %3728 = vrsqrt.f32 %v2591_v15 }
0x178e   : > { %v3729_v16 = vpop.eup %3728 }
0x178f   : > { %v2593_v18 = vmul.f32 %v3729_v16, %v2585_v2 }
0x1791   : > { %v2600_v46 = vmul.f32 %v3139_v17, %v2593_v18 }
0x1793   : > { %v2607_v20 = vadd.f32 %v3140_v19, %v2600_v46 }
0x1795   : > { %3476 = vmatmul.mubr.msk.f32.vlgmr.msra.gmra.mxu1 %vm1006_vm3, %v2607_v20 }
0x1796   : > { %3486 = vmatprep.mubr.msk.f32.mxu1 %vm4275_vm0, %v4274_v0  ;;  %3479 = vmatpush3.msra.mxu1 %v2717_v30 }
0x1797   : > { %3480 = vmatprep.subr.mxu1 %v4274_v0 }
0x1798   : > { %3481 = vmatpush3.msra.mxu1 %v2716_v31 }
0x1799   : > { %3482 = vmatprep.subr.mxu1 %v4274_v0 }
0x179a   : > { %3483 = vmatpush3.msra.mxu1 %v2715_v32 }
0x179b   : > { %3484 = vmatprep.subr.mxu1 %v4274_v0 }
0x179c   : > { %3485 = vmatpush3.msra.mxu1 %v2714_v33 }
0x1855   : > { %v2692_v45 = vpop.f32.mrf.mxu1 }
0x1856   : > { %v2693_v51 = vadd.f32 %v3141_v21, %v2692_v45 }
0x1857   : > { %v3477_v22 = vpop.f32.mrf.mxu1 }
0x1858   : > { %3730 = vtanh.f32 %v2693_v51  ;;  %v3143_v24 = vmul.f32 -1.442695, %v2693_v51 }
0x185a   : > { %3732 = vpow2.f32 %v3143_v24 }
0x1865   : > { %v3731_v23 = vpop.eup %3730 }
0x1866   : > { %2704 = vrot.lane.b32.xlu0 %v3731_v23, %s4277_s0  ;;  %s908_s0 = sand.u32 1, %s4242_s28  }
0x1867   : > { %v3733_v25 = vpop.eup %3732  ;;  %s909_s2 = scalar_lea.vmem [#allocation28], %s908_s0 }
0x1868   : > { %v2699_v26 = vadd.f32 1.0, %v3733_v25  ;;  %s2808_s22 = sshll.u32 %s909_s2, 4  ;;  %s2809_s22 = int_to_ptr.vmem [resolvable:$true] %s2808_s22 }
0x1869   : > { %p4161_p0 = scmp.lt.s32.totalorder %s2809_s22, %s4159_s4 }
0x186a   : > { %3734 = vrcp.f32 %v2699_v26 }
0x1877   : > { %v3735_v27 = vpop.eup %3734 }
0x18d8   : > { %v2705_v28 = vpop.permute.xlu0 %2704 }
0x18d9   : > { %v2707_v29 = vmul.f32 %v3735_v27, %v2705_v28 }
0x18db   : > { %3736 = vtanh.f32 %v2707_v29 }
0x18e8   : > { %v3737_v34 = vpop.eup %3736 }
0x18e9   : > { %2710 = vrot.lane.b32.xlu1 %v3737_v34, %s4276_s3  ;;  %s2796_s3 = scalar_lea.sflag [#allocation4], %s908_s0 }
0x195b   : > { %v2711_v35 = vpop.permute.xlu1 %2710 }
0x195c   : > { %v2713_v36 = vmul.f32 %v3735_v27, %v2711_v35 }
0x195e   : > { %2720 = vrot.lane.b32.xlu1 %v2713_v36, %s4278_s24  ;;  %s4154_s24 = scalar_lea.vmem %s2809_s22, 16 }
0x195f   : > { %p4155_p12 = scmp.ne.s32.totalorder %s2809_s22, %s4154_s24  ;;  %p4162_p1 = scmp.lt.s32.totalorder %s4160_s7, %s4154_s24 }
0x1961   : > { %p4156_p8 = pnand %p4155_p12, %p5271_p7  ;;  %p4163_p2 = por %p4162_p1, %p4161_p0 }
0x1963   : > { %p4157_p11 = pneg %p4156_p8 }
0x1965   : > { %p4164_p9 = pnand %p4163_p2, %p4157_p11 }
0x19d0   : > { %v2721_v37 = vpop.permute.xlu1 %2720 }
0x19d1   : > { %3487 = vmatmul.mubr.msk.f32.vlgmr.msra.gmra.mxu1 %vm1141_vm4, %v2721_v37 }
0x1a91   : > { %v2790_v39 = vpop.f32.mrf.mxu1 }
0x1a92   : > { %v2791_v40 = vadd.f32 %v2790_v39, %v2718_v38 }
0x1a93   : > { %v3488_v0 = vpop.f32.mrf.mxu1 }
0x1a94   : > { %2794 = vst [vmem:[%s909_s2] sm:$0x1] %v2791_v40 }
0x1a95   : > { %4167 = shalt.err (!%p4164_p9)
}
0x1a96   : > { %s4168_s27 = scalar_lea.hbm %s5137_s12, 16  ;;  %s4172_s26 = scalar_lea.hbm %s5270_s10, 32 }
0x1a97   : > { %p4169_p3 = scmp.ne.s32.totalorder %s5137_s12, %s4168_s27  ;;  %p4173_p5 = scmp.lt.s32.totalorder %s5137_s12, %s5270_s10 }
0x1a98   : > { %p4174_p6 = scmp.lt.s32.totalorder %s4172_s26, %s4168_s27 }
0x1a99   : > { %p4170_p4 = pnand %p4169_p3, %p5271_p7 }
0x1a9a   : > { %p4175_p10 = por %p4174_p6, %p4173_p5 }
0x1a9b   : > { %p4171_p13 = pneg %p4170_p4 }
0x1a9d   : > { %p4176_p12 = pnand %p4175_p10, %p4171_p13 }
0x1a9f   : > { %4179 = shalt.err (!%p4176_p12)
}
0x1aa0   : > { %3553 = dma.vmem_to_hbm [thread:$0]  (%p5271_p7), %s2809_s22, 16, %s5137_s12, %s2796_s3  }
0x1aa1 PF: > { %s5272_s29 = sld [smem:[#allocation41_spill]] }
0x1aa2   : > { %s5273_s24 = sld [smem:[#allocation39_spill]] }
0x1aa3   : > { %s5274_s30 = sld [smem:[#allocation44_spill]] }
0x1aa7   : > { %p3640_p8 = scmp.ge.s32.totalorder %s5272_s29, 2 }
0x1aa8   : > { %s2820_s4 = sand.u32 1, %s5273_s24  }
0x1aa9   : > { %p5275_p11 = scmp.ne.s32.totalorder %s5274_s30, 0  ;;  %s2821_s7 = scalar_lea.sflag [#allocation4], %s2820_s4 }
0x1aab   : > { %p3605_p0 = pnand %p3640_p8, %p5275_p11 }
0x1aad   : > { %p3606_p1 = pneg %p3605_p0 }
0x1aaf   : > { %4233 = dma.done.wait (%p3606_p1), %s2821_s7, 16  }
0x1ab0   : > { %4235 = vsyncadd (%p3606_p1), %s2821_s7, 4294967280  ;;  %s5276_s30 = sld [smem:[#allocation42_spill]]  ;;  %s5279_s3 = smov %s4242_s28 }
0x1ab1   : > { %s5277_s27 = sld [smem:[#allocation40_spill]] }
0x1ab2   : > { %s5278_s29 = sld [smem:[#allocation43_spill]] }
0x1ab6   : > { %p41_p2 = scmp.ge.s32.totalorder %s5276_s30, 4  }
0x1ab7   : > { %s5280_s28 = smov %s5277_s27 }
0x1ab8   :  { %43 = sbr.rel (!%p41_p2) target bundleno = 24 (0x18), region = 223 }
0x1abd   :  { %2825 = vsyncpa [#allocation3], 1 }
0x1abe   :  { %2827 = vsyncpa [#allocation3 + $0x1], 1 }
0x1abf   :  { %2828 = vsyncpa [#allocation6], 1 }
0x1ac0   :  { %2829 = vsyncpa [#allocation9], 1 }
0x1ac1   :  { %2830 = vsyncpa [#allocation12], 1 }
0x1ac2   :  { %2831 = vsyncpa [#allocation15], 1 }
0x1ac3   :  { %2832 = vsyncpa [#allocation18], 1 }
0x1ac4   :  { %2833 = vsyncpa [#allocation21], 1 }
0x1ac5   :  { %2834 = vsyncpa [#allocation24], 1 }
0x1ac6   :  { %2835 = vsyncpa [#allocation27], 1 }
0x1ac7   :  { %2836 = vsyncpa [#allocation4], 1 }
0x1ac8   :  { %2838 = vsyncpa [#allocation4 + $0x1], 1 }

</bundles_post_ra>
